<compile_context>
chip_gen: v7x
topology: tpu7x:2x2x1
jax: 0.10.0
libtpu: 0.0.40
codegen_flags: <defaults>
</compile_context>

<pallas_src>
import functools
import math

import jax
import jax.numpy as jnp
from jax import lax
from jax.experimental import pallas as pl
from jax.experimental.pallas import tpu as pltpu

EPS_IN = 1e-3   # InstanceNorm1d(eps=0.001)
EPS_BN = 1e-5   # BatchNorm1d default eps


def _inliner_kernel(x_ref, w1_ref, wp_ref, pp_ref, o_ref, *, n_batch, length):
    nl = n_batch * length
    inv_l = 1.0 / float(length)

    x = x_ref[...]            # (Cin, N*L) lane-stacked input slab
    w1 = w1_ref[...]          # (64, Cin)
    wp = wp_ref[...]          # (21, 64)  packed small conv weights
    pp = pp_ref[...]          # (85, 2)   packed per-channel params

    w2 = wp[0:16, 0:64]
    w3 = wp[16:20, 0:16]
    w4 = wp[20:21, 0:4]
    g1, t1 = pp[0:64, 0:1], pp[0:64, 1:2]
    g2, t2 = pp[64:80, 0:1], pp[64:80, 1:2]
    g3, t3 = pp[80:84, 0:1], pp[80:84, 1:2]
    b4 = pp[84:85, 0:1]

    # Segment matrices, built once from 2-D iotas (no integer division, no reshapes):
    #   Bt[j, n] = 1 iff lane position j belongs to batch n   -> (N*L, N) segment-sum
    #   B [n, j] = 1 iff lane position j belongs to batch n   -> (N, N*L) broadcast-back
    one, zero = jnp.float32(1.0), jnp.float32(0.0)
    jt = lax.broadcasted_iota(jnp.int32, (nl, n_batch), 0)
    nt = lax.broadcasted_iota(jnp.int32, (nl, n_batch), 1) * length
    Bt = jnp.where((jt >= nt) & (jt < nt + length), one, zero)
    nb = lax.broadcasted_iota(jnp.int32, (n_batch, nl), 0) * length
    jb = lax.broadcasted_iota(jnp.int32, (n_batch, nl), 1)
    B = jnp.where((jb >= nb) & (jb < nb + length), one, zero)

    def block(h, W, g, t):
        cout, cin = W.shape
        # Conv1d(k=1).  Bias dropped: a per-channel bias is exactly cancelled by the
        # InstanceNorm mean subtraction that follows.
        if cout >= 64 or cin >= 64:
            y = jnp.dot(W, h, preferred_element_type=jnp.float32)            # MXU
        else:
            y = W[:, 0:1] * h[0:1, :]                                        # VPU FMAs
            for c in range(1, cin):
                y = y + W[:, c:c + 1] * h[c:c + 1, :]
        # Per-(n,c) InstanceNorm stats: two independent segment reductions on the MXU.
        m = jnp.dot(y, Bt, preferred_element_type=jnp.float32) * inv_l       # mean  (C,N)
        s2 = jnp.dot(y * y, Bt, preferred_element_type=jnp.float32) * inv_l  # E[y^2](C,N)
        v = jnp.maximum(s2 - m * m, 0.0)                                     # biased var
        inv_in = lax.rsqrt(v + EPS_IN)                                       # (C, N)
        # BatchNorm1d (training-mode batch stats): batch mean of z is exactly 0; batch
        # variance per channel is mean_n of the per-batch second moment v/(v+eps_in).
        vb = jnp.mean(v * inv_in * inv_in, axis=1, keepdims=True)            # (C, 1)
        s_bn = lax.rsqrt(vb + EPS_BN) * g                                    # (C, 1)
        scale = inv_in * s_bn                                                # (C, N)
        shift = t - m * scale                                                # (C, N)
        # Broadcast the fused per-(n,c) affine back to lane positions (exact: a single
        # 1.0 per column of B), then one FMA + ReLU over the full slab.
        scale_f = jnp.dot(scale, B, preferred_element_type=jnp.float32)      # (C, N*L)
        shift_f = jnp.dot(shift, B, preferred_element_type=jnp.float32)      # (C, N*L)
        return jnp.maximum(y * scale_f + shift_f, 0.0)

    h = block(x, w1, g1, t1)
    h = block(h, w2, g2, t2)
    h = block(h, w3, g3, t3)

    # Final Conv1d(4 -> 1): four VPU FMAs, one lane-dense (1, N*L) store.
    o = w4[0:1, 0:1] * h[0:1, :]
    for c in range(1, 4):
        o = o + w4[0:1, c:c + 1] * h[c:c + 1, :]
    o_ref[...] = o + b4


def init_params(key, channels):
    """Deterministic synthetic parameters matching the PyTorch module's shapes."""
    dims = [(64, channels), (16, 64), (4, 16), (1, 4)]
    keys = jax.random.split(key, 2 * len(dims))
    params = []
    for i, (co, ci) in enumerate(dims):
        bound = 1.0 / math.sqrt(ci)
        W = jax.random.uniform(keys[2 * i], (co, ci), jnp.float32, -bound, bound)
        b = jax.random.uniform(keys[2 * i + 1], (co, 1), jnp.float32, -bound, bound)
        if i < 3:
            gamma = jnp.ones((co, 1), jnp.float32)    # BatchNorm affine defaults
            beta = jnp.zeros((co, 1), jnp.float32)
            params.append((W, b, gamma, beta))
        else:
            params.append((W, b))
    return params


def pack_params(params):
    """Pack small weights / per-channel params so the kernel takes 4 inputs, not 12."""
    (w1, b1, g1, t1), (w2, b2, g2, t2), (w3, b3, g3, t3), (w4, b4) = params
    del b1, b2, b3  # bias before InstanceNorm is a no-op (cancelled by mean subtraction)
    wp = jnp.zeros((21, 64), jnp.float32)
    wp = wp.at[0:16, 0:64].set(w2)
    wp = wp.at[16:20, 0:16].set(w3)
    wp = wp.at[20:21, 0:4].set(w4)
    pp = jnp.zeros((85, 2), jnp.float32)
    pp = pp.at[0:64, 0:1].set(g1).at[0:64, 1:2].set(t1)
    pp = pp.at[64:80, 0:1].set(g2).at[64:80, 1:2].set(t2)
    pp = pp.at[80:84, 0:1].set(g3).at[80:84, 1:2].set(t3)
    pp = pp.at[84:85, 0:1].set(b4)
    return w1, wp, pp


def inliner_predictor(x, params):
    """x: (N, C, L) float32 (PyTorch NCL). Returns (N, 1, L). Training-mode BatchNorm."""
    N, C, L = x.shape
    w1, wp, pp = pack_params(params)
    # Lane-stacked activation layout: channels -> sublanes, batch*length -> lanes.
    x2 = jnp.transpose(x, (1, 0, 2)).reshape(C, N * L)

    try:
        vmem_cap = pltpu.get_tpu_info().vmem_capacity_bytes
    except Exception:  # conservative fallback (v7x per-TC capacity)
        vmem_cap = 64 << 20
    # Working set: input slab + a few live 64-wide activation slabs (+ headroom),
    # capped at 50% of physical VMEM so v7x keeps pipelining/scratch headroom.
    vmem_bytes = int(min(4 * N * L * (C + 4 * 64) + (4 << 20), vmem_cap // 2))

    vspec = pl.BlockSpec(memory_space=pltpu.MemorySpace.VMEM)
    out = pl.pallas_call(
        functools.partial(_inliner_kernel, n_batch=N, length=L),
        out_shape=jax.ShapeDtypeStruct((1, N * L), jnp.float32),
        in_specs=[vspec] * 4,
        out_specs=vspec,
        compiler_params=pltpu.CompilerParams(vmem_limit_bytes=vmem_bytes),
    )(x2, w1, wp, pp)
    return out.reshape(1, N, L).transpose(1, 0, 2)


def reference(x, params):
    """Pure-JAX replica of the PyTorch forward (training-mode BatchNorm)."""
    h = x
    for (W, b, g, t) in params[:3]:
        y = jnp.einsum('oc,ncl->nol', W, h) + b.reshape(1, -1, 1)
        m = y.mean(-1, keepdims=True)
        v = ((y - m) ** 2).mean(-1, keepdims=True)
        z = (y - m) / jnp.sqrt(v + EPS_IN)
        mb = z.mean(axis=(0, 2), keepdims=True)
        vb = ((z - mb) ** 2).mean(axis=(0, 2), keepdims=True)
        zn = (z - mb) / jnp.sqrt(vb + EPS_BN)
        zn = zn * g.reshape(1, -1, 1) + t.reshape(1, -1, 1)
        h = jnp.maximum(zn, 0.0)
    W4, b4 = params[3]
    return jnp.einsum('oc,ncl->nol', W4, h) + b4.reshape(1, -1, 1)


if __name__ == "__main__":
    key = jax.random.PRNGKey(0)
    kx, kp = jax.random.split(key)

    batch, channels, length = 2, 4, 128
    x = jax.random.normal(kx, (batch, channels, length), jnp.float32)
    params = init_params(kp, channels)

    out = jax.block_until_ready(inliner_predictor(x, params))
    ref = jax.block_until_ready(reference(x, params))

    assert out.shape == (batch, 1, length), out.shape
    assert jnp.allclose(out, ref, rtol=2e-4, atol=2e-4), float(jnp.max(jnp.abs(out - ref)))
    print("KERNEL_OK")
</pallas_src>

<mosaic_0001>
module attributes {stable_mosaic.version = 11 : i64} {
  func.func @_inliner_kernel(%arg0: memref<4x256xf32, #tpu.memory_space<vmem>>, %arg1: memref<64x4xf32, #tpu.memory_space<vmem>>, %arg2: memref<21x64xf32, #tpu.memory_space<vmem>>, %arg3: memref<85x2xf32, #tpu.memory_space<vmem>>, %arg4: memref<1x256xf32, #tpu.memory_space<vmem>>) attributes {dimension_semantics = [], scalar_prefetch = 0 : i64, scratch_operands = 0 : i64, tpu.core_type = #tpu.core_type<tc>} {
    %c0 = arith.constant 0 : index
    %c0_0 = arith.constant 0 : index
    %0 = vector.load %arg0[%c0, %c0_0] : memref<4x256xf32, #tpu.memory_space<vmem>>, vector<4x256xf32>
    %c0_1 = arith.constant 0 : index
    %c0_2 = arith.constant 0 : index
    %1 = vector.load %arg1[%c0_1, %c0_2] : memref<64x4xf32, #tpu.memory_space<vmem>>, vector<64x4xf32>
    %c0_3 = arith.constant 0 : index
    %c0_4 = arith.constant 0 : index
    %2 = vector.load %arg2[%c0_3, %c0_4] : memref<21x64xf32, #tpu.memory_space<vmem>>, vector<21x64xf32>
    %c0_5 = arith.constant 0 : index
    %c0_6 = arith.constant 0 : index
    %3 = vector.load %arg3[%c0_5, %c0_6] : memref<85x2xf32, #tpu.memory_space<vmem>>, vector<85x2xf32>
    %4 = vector.extract_strided_slice %2 {offsets = [0, 0], sizes = [16, 64], strides = [1, 1]} : vector<21x64xf32> to vector<16x64xf32>
    %5 = vector.extract_strided_slice %2 {offsets = [16, 0], sizes = [4, 16], strides = [1, 1]} : vector<21x64xf32> to vector<4x16xf32>
    %6 = vector.extract_strided_slice %2 {offsets = [20, 0], sizes = [1, 4], strides = [1, 1]} : vector<21x64xf32> to vector<1x4xf32>
    %7 = vector.extract_strided_slice %3 {offsets = [0, 0], sizes = [64, 1], strides = [1, 1]} : vector<85x2xf32> to vector<64x1xf32>
    %8 = vector.extract_strided_slice %3 {offsets = [0, 1], sizes = [64, 1], strides = [1, 1]} : vector<85x2xf32> to vector<64x1xf32>
    %9 = vector.extract_strided_slice %3 {offsets = [64, 0], sizes = [16, 1], strides = [1, 1]} : vector<85x2xf32> to vector<16x1xf32>
    %10 = vector.extract_strided_slice %3 {offsets = [64, 1], sizes = [16, 1], strides = [1, 1]} : vector<85x2xf32> to vector<16x1xf32>
    %11 = vector.extract_strided_slice %3 {offsets = [80, 0], sizes = [4, 1], strides = [1, 1]} : vector<85x2xf32> to vector<4x1xf32>
    %12 = vector.extract_strided_slice %3 {offsets = [80, 1], sizes = [4, 1], strides = [1, 1]} : vector<85x2xf32> to vector<4x1xf32>
    %13 = vector.extract_strided_slice %3 {offsets = [84, 0], sizes = [1, 1], strides = [1, 1]} : vector<85x2xf32> to vector<1x1xf32>
    %14 = tpu.iota {dimensions = array<i32: 0>} : vector<256x2xi32>
    %15 = tpu.iota {dimensions = array<i32: 1>} : vector<256x2xi32>
    %c128_i32 = arith.constant 128 : i32
    %16 = vector.broadcast %c128_i32 : i32 to vector<256x2xi32>
    %17 = arith.muli %15, %16 : vector<256x2xi32>
    %18 = arith.cmpi sge, %14, %17 : vector<256x2xi32>
    %c128_i32_7 = arith.constant 128 : i32
    %19 = vector.broadcast %c128_i32_7 : i32 to vector<256x2xi32>
    %20 = arith.addi %17, %19 : vector<256x2xi32>
    %21 = arith.cmpi slt, %14, %20 : vector<256x2xi32>
    %22 = arith.andi %18, %21 : vector<256x2xi1>
    %cst = arith.constant 1.000000e+00 : f32
    %cst_8 = arith.constant 0.000000e+00 : f32
    %23 = vector.broadcast %cst : f32 to vector<256x2xf32>
    %24 = vector.broadcast %cst_8 : f32 to vector<256x2xf32>
    %25 = arith.select %22, %23, %24 : vector<256x2xi1>, vector<256x2xf32>
    %26 = tpu.iota {dimensions = array<i32: 0>} : vector<2x256xi32>
    %c128_i32_9 = arith.constant 128 : i32
    %27 = vector.broadcast %c128_i32_9 : i32 to vector<2x256xi32>
    %28 = arith.muli %26, %27 : vector<2x256xi32>
    %29 = tpu.iota {dimensions = array<i32: 1>} : vector<2x256xi32>
    %30 = arith.cmpi sge, %29, %28 : vector<2x256xi32>
    %c128_i32_10 = arith.constant 128 : i32
    %31 = vector.broadcast %c128_i32_10 : i32 to vector<2x256xi32>
    %32 = arith.addi %28, %31 : vector<2x256xi32>
    %33 = arith.cmpi slt, %29, %32 : vector<2x256xi32>
    %34 = arith.andi %30, %33 : vector<2x256xi1>
    %cst_11 = arith.constant 1.000000e+00 : f32
    %cst_12 = arith.constant 0.000000e+00 : f32
    %35 = vector.broadcast %cst_11 : f32 to vector<2x256xf32>
    %36 = vector.broadcast %cst_12 : f32 to vector<2x256xf32>
    %37 = arith.select %34, %35, %36 : vector<2x256xi1>, vector<2x256xf32>
    %cst_13 = arith.constant dense<0.000000e+00> : vector<64x256xf32>
    %38 = tpu.matmul %1, %0, %cst_13 {dimension_numbers = #tpu.dot_dimension_numbers<[1], [0], [0], [1], [0, 0, 1, 1], [], []>} : vector<64x4xf32>, vector<4x256xf32>, vector<64x256xf32> -> vector<64x256xf32>
    %cst_14 = arith.constant dense<0.000000e+00> : vector<64x2xf32>
    %39 = tpu.matmul %38, %25, %cst_14 {dimension_numbers = #tpu.dot_dimension_numbers<[1], [0], [0], [1], [0, 0, 1, 1], [], []>} : vector<64x256xf32>, vector<256x2xf32>, vector<64x2xf32> -> vector<64x2xf32>
    %cst_15 = arith.constant 7.812500e-03 : f32
    %40 = vector.broadcast %cst_15 : f32 to vector<64x2xf32>
    %41 = arith.mulf %39, %40 : vector<64x2xf32>
    %42 = arith.mulf %38, %38 : vector<64x256xf32>
    %cst_16 = arith.constant dense<0.000000e+00> : vector<64x2xf32>
    %43 = tpu.matmul %42, %25, %cst_16 {dimension_numbers = #tpu.dot_dimension_numbers<[1], [0], [0], [1], [0, 0, 1, 1], [], []>} : vector<64x256xf32>, vector<256x2xf32>, vector<64x2xf32> -> vector<64x2xf32>
    %cst_17 = arith.constant 7.812500e-03 : f32
    %44 = vector.broadcast %cst_17 : f32 to vector<64x2xf32>
    %45 = arith.mulf %43, %44 : vector<64x2xf32>
    %46 = arith.mulf %41, %41 : vector<64x2xf32>
    %47 = arith.subf %45, %46 : vector<64x2xf32>
    %cst_18 = arith.constant 0.000000e+00 : f32
    %48 = vector.broadcast %cst_18 : f32 to vector<64x2xf32>
    %49 = arith.maximumf %47, %48 : vector<64x2xf32>
    %cst_19 = arith.constant 1.000000e-03 : f32
    %50 = vector.broadcast %cst_19 : f32 to vector<64x2xf32>
    %51 = arith.addf %49, %50 : vector<64x2xf32>
    %52 = math.rsqrt %51 : vector<64x2xf32>
    %53 = arith.mulf %49, %52 : vector<64x2xf32>
    %54 = arith.mulf %53, %52 : vector<64x2xf32>
    %cst_20 = arith.constant dense<0.000000e+00> : vector<64xf32>
    %55 = vector.multi_reduction <add>, %54, %cst_20 [1] : vector<64x2xf32> to vector<64xf32>
    %56 = vector.shape_cast %55 : vector<64xf32> to vector<64x1xf32>
    %cst_21 = arith.constant 2.000000e+00 : f32
    %57 = vector.broadcast %cst_21 : f32 to vector<64x1xf32>
    %58 = arith.divf %56, %57 : vector<64x1xf32>
    %cst_22 = arith.constant 9.99999974E-6 : f32
    %59 = vector.broadcast %cst_22 : f32 to vector<64x1xf32>
    %60 = arith.addf %58, %59 : vector<64x1xf32>
    %61 = math.rsqrt %60 : vector<64x1xf32>
    %62 = arith.mulf %61, %7 : vector<64x1xf32>
    %63 = vector.broadcast %62 : vector<64x1xf32> to vector<64x2xf32>
    %64 = arith.mulf %52, %63 : vector<64x2xf32>
    %65 = arith.mulf %41, %64 : vector<64x2xf32>
    %66 = vector.broadcast %8 : vector<64x1xf32> to vector<64x2xf32>
    %67 = arith.subf %66, %65 : vector<64x2xf32>
    %cst_23 = arith.constant dense<0.000000e+00> : vector<64x256xf32>
    %68 = tpu.matmul %64, %37, %cst_23 {dimension_numbers = #tpu.dot_dimension_numbers<[1], [0], [0], [1], [0, 0, 1, 1], [], []>} : vector<64x2xf32>, vector<2x256xf32>, vector<64x256xf32> -> vector<64x256xf32>
    %cst_24 = arith.constant dense<0.000000e+00> : vector<64x256xf32>
    %69 = tpu.matmul %67, %37, %cst_24 {dimension_numbers = #tpu.dot_dimension_numbers<[1], [0], [0], [1], [0, 0, 1, 1], [], []>} : vector<64x2xf32>, vector<2x256xf32>, vector<64x256xf32> -> vector<64x256xf32>
    %70 = arith.mulf %38, %68 : vector<64x256xf32>
    %71 = arith.addf %70, %69 : vector<64x256xf32>
    %cst_25 = arith.constant 0.000000e+00 : f32
    %72 = vector.broadcast %cst_25 : f32 to vector<64x256xf32>
    %73 = arith.maximumf %71, %72 : vector<64x256xf32>
    %cst_26 = arith.constant dense<0.000000e+00> : vector<16x256xf32>
    %74 = tpu.matmul %4, %73, %cst_26 {dimension_numbers = #tpu.dot_dimension_numbers<[1], [0], [0], [1], [0, 0, 1, 1], [], []>} : vector<16x64xf32>, vector<64x256xf32>, vector<16x256xf32> -> vector<16x256xf32>
    %cst_27 = arith.constant dense<0.000000e+00> : vector<16x2xf32>
    %75 = tpu.matmul %74, %25, %cst_27 {dimension_numbers = #tpu.dot_dimension_numbers<[1], [0], [0], [1], [0, 0, 1, 1], [], []>} : vector<16x256xf32>, vector<256x2xf32>, vector<16x2xf32> -> vector<16x2xf32>
    %cst_28 = arith.constant 7.812500e-03 : f32
    %76 = vector.broadcast %cst_28 : f32 to vector<16x2xf32>
    %77 = arith.mulf %75, %76 : vector<16x2xf32>
    %78 = arith.mulf %74, %74 : vector<16x256xf32>
    %cst_29 = arith.constant dense<0.000000e+00> : vector<16x2xf32>
    %79 = tpu.matmul %78, %25, %cst_29 {dimension_numbers = #tpu.dot_dimension_numbers<[1], [0], [0], [1], [0, 0, 1, 1], [], []>} : vector<16x256xf32>, vector<256x2xf32>, vector<16x2xf32> -> vector<16x2xf32>
    %cst_30 = arith.constant 7.812500e-03 : f32
    %80 = vector.broadcast %cst_30 : f32 to vector<16x2xf32>
    %81 = arith.mulf %79, %80 : vector<16x2xf32>
    %82 = arith.mulf %77, %77 : vector<16x2xf32>
    %83 = arith.subf %81, %82 : vector<16x2xf32>
    %cst_31 = arith.constant 0.000000e+00 : f32
    %84 = vector.broadcast %cst_31 : f32 to vector<16x2xf32>
    %85 = arith.maximumf %83, %84 : vector<16x2xf32>
    %cst_32 = arith.constant 1.000000e-03 : f32
    %86 = vector.broadcast %cst_32 : f32 to vector<16x2xf32>
    %87 = arith.addf %85, %86 : vector<16x2xf32>
    %88 = math.rsqrt %87 : vector<16x2xf32>
    %89 = arith.mulf %85, %88 : vector<16x2xf32>
    %90 = arith.mulf %89, %88 : vector<16x2xf32>
    %cst_33 = arith.constant dense<0.000000e+00> : vector<16xf32>
    %91 = vector.multi_reduction <add>, %90, %cst_33 [1] : vector<16x2xf32> to vector<16xf32>
    %92 = vector.shape_cast %91 : vector<16xf32> to vector<16x1xf32>
    %cst_34 = arith.constant 2.000000e+00 : f32
    %93 = vector.broadcast %cst_34 : f32 to vector<16x1xf32>
    %94 = arith.divf %92, %93 : vector<16x1xf32>
    %cst_35 = arith.constant 9.99999974E-6 : f32
    %95 = vector.broadcast %cst_35 : f32 to vector<16x1xf32>
    %96 = arith.addf %94, %95 : vector<16x1xf32>
    %97 = math.rsqrt %96 : vector<16x1xf32>
    %98 = arith.mulf %97, %9 : vector<16x1xf32>
    %99 = vector.broadcast %98 : vector<16x1xf32> to vector<16x2xf32>
    %100 = arith.mulf %88, %99 : vector<16x2xf32>
    %101 = arith.mulf %77, %100 : vector<16x2xf32>
    %102 = vector.broadcast %10 : vector<16x1xf32> to vector<16x2xf32>
    %103 = arith.subf %102, %101 : vector<16x2xf32>
    %cst_36 = arith.constant dense<0.000000e+00> : vector<16x256xf32>
    %104 = tpu.matmul %100, %37, %cst_36 {dimension_numbers = #tpu.dot_dimension_numbers<[1], [0], [0], [1], [0, 0, 1, 1], [], []>} : vector<16x2xf32>, vector<2x256xf32>, vector<16x256xf32> -> vector<16x256xf32>
    %cst_37 = arith.constant dense<0.000000e+00> : vector<16x256xf32>
    %105 = tpu.matmul %103, %37, %cst_37 {dimension_numbers = #tpu.dot_dimension_numbers<[1], [0], [0], [1], [0, 0, 1, 1], [], []>} : vector<16x2xf32>, vector<2x256xf32>, vector<16x256xf32> -> vector<16x256xf32>
    %106 = arith.mulf %74, %104 : vector<16x256xf32>
    %107 = arith.addf %106, %105 : vector<16x256xf32>
    %cst_38 = arith.constant 0.000000e+00 : f32
    %108 = vector.broadcast %cst_38 : f32 to vector<16x256xf32>
    %109 = arith.maximumf %107, %108 : vector<16x256xf32>
    %110 = vector.extract_strided_slice %5 {offsets = [0, 0], sizes = [4, 1], strides = [1, 1]} : vector<4x16xf32> to vector<4x1xf32>
    %111 = vector.extract_strided_slice %109 {offsets = [0, 0], sizes = [1, 256], strides = [1, 1]} : vector<16x256xf32> to vector<1x256xf32>
    %112 = vector.broadcast %110 : vector<4x1xf32> to vector<4x256xf32>
    %113 = vector.broadcast %111 : vector<1x256xf32> to vector<4x256xf32>
    %114 = arith.mulf %112, %113 : vector<4x256xf32>
    %115 = vector.extract_strided_slice %5 {offsets = [0, 1], sizes = [4, 1], strides = [1, 1]} : vector<4x16xf32> to vector<4x1xf32>
    %116 = vector.extract_strided_slice %109 {offsets = [1, 0], sizes = [1, 256], strides = [1, 1]} : vector<16x256xf32> to vector<1x256xf32>
    %117 = vector.broadcast %115 : vector<4x1xf32> to vector<4x256xf32>
    %118 = vector.broadcast %116 : vector<1x256xf32> to vector<4x256xf32>
    %119 = arith.mulf %117, %118 : vector<4x256xf32>
    %120 = arith.addf %114, %119 : vector<4x256xf32>
    %121 = vector.extract_strided_slice %5 {offsets = [0, 2], sizes = [4, 1], strides = [1, 1]} : vector<4x16xf32> to vector<4x1xf32>
    %122 = vector.extract_strided_slice %109 {offsets = [2, 0], sizes = [1, 256], strides = [1, 1]} : vector<16x256xf32> to vector<1x256xf32>
    %123 = vector.broadcast %121 : vector<4x1xf32> to vector<4x256xf32>
    %124 = vector.broadcast %122 : vector<1x256xf32> to vector<4x256xf32>
    %125 = arith.mulf %123, %124 : vector<4x256xf32>
    %126 = arith.addf %120, %125 : vector<4x256xf32>
    %127 = vector.extract_strided_slice %5 {offsets = [0, 3], sizes = [4, 1], strides = [1, 1]} : vector<4x16xf32> to vector<4x1xf32>
    %128 = vector.extract_strided_slice %109 {offsets = [3, 0], sizes = [1, 256], strides = [1, 1]} : vector<16x256xf32> to vector<1x256xf32>
    %129 = vector.broadcast %127 : vector<4x1xf32> to vector<4x256xf32>
    %130 = vector.broadcast %128 : vector<1x256xf32> to vector<4x256xf32>
    %131 = arith.mulf %129, %130 : vector<4x256xf32>
    %132 = arith.addf %126, %131 : vector<4x256xf32>
    %133 = vector.extract_strided_slice %5 {offsets = [0, 4], sizes = [4, 1], strides = [1, 1]} : vector<4x16xf32> to vector<4x1xf32>
    %134 = vector.extract_strided_slice %109 {offsets = [4, 0], sizes = [1, 256], strides = [1, 1]} : vector<16x256xf32> to vector<1x256xf32>
    %135 = vector.broadcast %133 : vector<4x1xf32> to vector<4x256xf32>
    %136 = vector.broadcast %134 : vector<1x256xf32> to vector<4x256xf32>
    %137 = arith.mulf %135, %136 : vector<4x256xf32>
    %138 = arith.addf %132, %137 : vector<4x256xf32>
    %139 = vector.extract_strided_slice %5 {offsets = [0, 5], sizes = [4, 1], strides = [1, 1]} : vector<4x16xf32> to vector<4x1xf32>
    %140 = vector.extract_strided_slice %109 {offsets = [5, 0], sizes = [1, 256], strides = [1, 1]} : vector<16x256xf32> to vector<1x256xf32>
    %141 = vector.broadcast %139 : vector<4x1xf32> to vector<4x256xf32>
    %142 = vector.broadcast %140 : vector<1x256xf32> to vector<4x256xf32>
    %143 = arith.mulf %141, %142 : vector<4x256xf32>
    %144 = arith.addf %138, %143 : vector<4x256xf32>
    %145 = vector.extract_strided_slice %5 {offsets = [0, 6], sizes = [4, 1], strides = [1, 1]} : vector<4x16xf32> to vector<4x1xf32>
    %146 = vector.extract_strided_slice %109 {offsets = [6, 0], sizes = [1, 256], strides = [1, 1]} : vector<16x256xf32> to vector<1x256xf32>
    %147 = vector.broadcast %145 : vector<4x1xf32> to vector<4x256xf32>
    %148 = vector.broadcast %146 : vector<1x256xf32> to vector<4x256xf32>
    %149 = arith.mulf %147, %148 : vector<4x256xf32>
    %150 = arith.addf %144, %149 : vector<4x256xf32>
    %151 = vector.extract_strided_slice %5 {offsets = [0, 7], sizes = [4, 1], strides = [1, 1]} : vector<4x16xf32> to vector<4x1xf32>
    %152 = vector.extract_strided_slice %109 {offsets = [7, 0], sizes = [1, 256], strides = [1, 1]} : vector<16x256xf32> to vector<1x256xf32>
    %153 = vector.broadcast %151 : vector<4x1xf32> to vector<4x256xf32>
    %154 = vector.broadcast %152 : vector<1x256xf32> to vector<4x256xf32>
    %155 = arith.mulf %153, %154 : vector<4x256xf32>
    %156 = arith.addf %150, %155 : vector<4x256xf32>
    %157 = vector.extract_strided_slice %5 {offsets = [0, 8], sizes = [4, 1], strides = [1, 1]} : vector<4x16xf32> to vector<4x1xf32>
    %158 = vector.extract_strided_slice %109 {offsets = [8, 0], sizes = [1, 256], strides = [1, 1]} : vector<16x256xf32> to vector<1x256xf32>
    %159 = vector.broadcast %157 : vector<4x1xf32> to vector<4x256xf32>
    %160 = vector.broadcast %158 : vector<1x256xf32> to vector<4x256xf32>
    %161 = arith.mulf %159, %160 : vector<4x256xf32>
    %162 = arith.addf %156, %161 : vector<4x256xf32>
    %163 = vector.extract_strided_slice %5 {offsets = [0, 9], sizes = [4, 1], strides = [1, 1]} : vector<4x16xf32> to vector<4x1xf32>
    %164 = vector.extract_strided_slice %109 {offsets = [9, 0], sizes = [1, 256], strides = [1, 1]} : vector<16x256xf32> to vector<1x256xf32>
    %165 = vector.broadcast %163 : vector<4x1xf32> to vector<4x256xf32>
    %166 = vector.broadcast %164 : vector<1x256xf32> to vector<4x256xf32>
    %167 = arith.mulf %165, %166 : vector<4x256xf32>
    %168 = arith.addf %162, %167 : vector<4x256xf32>
    %169 = vector.extract_strided_slice %5 {offsets = [0, 10], sizes = [4, 1], strides = [1, 1]} : vector<4x16xf32> to vector<4x1xf32>
    %170 = vector.extract_strided_slice %109 {offsets = [10, 0], sizes = [1, 256], strides = [1, 1]} : vector<16x256xf32> to vector<1x256xf32>
    %171 = vector.broadcast %169 : vector<4x1xf32> to vector<4x256xf32>
    %172 = vector.broadcast %170 : vector<1x256xf32> to vector<4x256xf32>
    %173 = arith.mulf %171, %172 : vector<4x256xf32>
    %174 = arith.addf %168, %173 : vector<4x256xf32>
    %175 = vector.extract_strided_slice %5 {offsets = [0, 11], sizes = [4, 1], strides = [1, 1]} : vector<4x16xf32> to vector<4x1xf32>
    %176 = vector.extract_strided_slice %109 {offsets = [11, 0], sizes = [1, 256], strides = [1, 1]} : vector<16x256xf32> to vector<1x256xf32>
    %177 = vector.broadcast %175 : vector<4x1xf32> to vector<4x256xf32>
    %178 = vector.broadcast %176 : vector<1x256xf32> to vector<4x256xf32>
    %179 = arith.mulf %177, %178 : vector<4x256xf32>
    %180 = arith.addf %174, %179 : vector<4x256xf32>
    %181 = vector.extract_strided_slice %5 {offsets = [0, 12], sizes = [4, 1], strides = [1, 1]} : vector<4x16xf32> to vector<4x1xf32>
    %182 = vector.extract_strided_slice %109 {offsets = [12, 0], sizes = [1, 256], strides = [1, 1]} : vector<16x256xf32> to vector<1x256xf32>
    %183 = vector.broadcast %181 : vector<4x1xf32> to vector<4x256xf32>
    %184 = vector.broadcast %182 : vector<1x256xf32> to vector<4x256xf32>
    %185 = arith.mulf %183, %184 : vector<4x256xf32>
    %186 = arith.addf %180, %185 : vector<4x256xf32>
    %187 = vector.extract_strided_slice %5 {offsets = [0, 13], sizes = [4, 1], strides = [1, 1]} : vector<4x16xf32> to vector<4x1xf32>
    %188 = vector.extract_strided_slice %109 {offsets = [13, 0], sizes = [1, 256], strides = [1, 1]} : vector<16x256xf32> to vector<1x256xf32>
    %189 = vector.broadcast %187 : vector<4x1xf32> to vector<4x256xf32>
    %190 = vector.broadcast %188 : vector<1x256xf32> to vector<4x256xf32>
    %191 = arith.mulf %189, %190 : vector<4x256xf32>
    %192 = arith.addf %186, %191 : vector<4x256xf32>
    %193 = vector.extract_strided_slice %5 {offsets = [0, 14], sizes = [4, 1], strides = [1, 1]} : vector<4x16xf32> to vector<4x1xf32>
    %194 = vector.extract_strided_slice %109 {offsets = [14, 0], sizes = [1, 256], strides = [1, 1]} : vector<16x256xf32> to vector<1x256xf32>
    %195 = vector.broadcast %193 : vector<4x1xf32> to vector<4x256xf32>
    %196 = vector.broadcast %194 : vector<1x256xf32> to vector<4x256xf32>
    %197 = arith.mulf %195, %196 : vector<4x256xf32>
    %198 = arith.addf %192, %197 : vector<4x256xf32>
    %199 = vector.extract_strided_slice %5 {offsets = [0, 15], sizes = [4, 1], strides = [1, 1]} : vector<4x16xf32> to vector<4x1xf32>
    %200 = vector.extract_strided_slice %109 {offsets = [15, 0], sizes = [1, 256], strides = [1, 1]} : vector<16x256xf32> to vector<1x256xf32>
    %201 = vector.broadcast %199 : vector<4x1xf32> to vector<4x256xf32>
    %202 = vector.broadcast %200 : vector<1x256xf32> to vector<4x256xf32>
    %203 = arith.mulf %201, %202 : vector<4x256xf32>
    %204 = arith.addf %198, %203 : vector<4x256xf32>
    %cst_39 = arith.constant dense<0.000000e+00> : vector<4x2xf32>
    %205 = tpu.matmul %204, %25, %cst_39 {dimension_numbers = #tpu.dot_dimension_numbers<[1], [0], [0], [1], [0, 0, 1, 1], [], []>} : vector<4x256xf32>, vector<256x2xf32>, vector<4x2xf32> -> vector<4x2xf32>
    %cst_40 = arith.constant 7.812500e-03 : f32
    %206 = vector.broadcast %cst_40 : f32 to vector<4x2xf32>
    %207 = arith.mulf %205, %206 : vector<4x2xf32>
    %208 = arith.mulf %204, %204 : vector<4x256xf32>
    %cst_41 = arith.constant dense<0.000000e+00> : vector<4x2xf32>
    %209 = tpu.matmul %208, %25, %cst_41 {dimension_numbers = #tpu.dot_dimension_numbers<[1], [0], [0], [1], [0, 0, 1, 1], [], []>} : vector<4x256xf32>, vector<256x2xf32>, vector<4x2xf32> -> vector<4x2xf32>
    %cst_42 = arith.constant 7.812500e-03 : f32
    %210 = vector.broadcast %cst_42 : f32 to vector<4x2xf32>
    %211 = arith.mulf %209, %210 : vector<4x2xf32>
    %212 = arith.mulf %207, %207 : vector<4x2xf32>
    %213 = arith.subf %211, %212 : vector<4x2xf32>
    %cst_43 = arith.constant 0.000000e+00 : f32
    %214 = vector.broadcast %cst_43 : f32 to vector<4x2xf32>
    %215 = arith.maximumf %213, %214 : vector<4x2xf32>
    %cst_44 = arith.constant 1.000000e-03 : f32
    %216 = vector.broadcast %cst_44 : f32 to vector<4x2xf32>
    %217 = arith.addf %215, %216 : vector<4x2xf32>
    %218 = math.rsqrt %217 : vector<4x2xf32>
    %219 = arith.mulf %215, %218 : vector<4x2xf32>
    %220 = arith.mulf %219, %218 : vector<4x2xf32>
    %cst_45 = arith.constant dense<0.000000e+00> : vector<4xf32>
    %221 = vector.multi_reduction <add>, %220, %cst_45 [1] : vector<4x2xf32> to vector<4xf32>
    %222 = vector.shape_cast %221 : vector<4xf32> to vector<4x1xf32>
    %cst_46 = arith.constant 2.000000e+00 : f32
    %223 = vector.broadcast %cst_46 : f32 to vector<4x1xf32>
    %224 = arith.divf %222, %223 : vector<4x1xf32>
    %cst_47 = arith.constant 9.99999974E-6 : f32
    %225 = vector.broadcast %cst_47 : f32 to vector<4x1xf32>
    %226 = arith.addf %224, %225 : vector<4x1xf32>
    %227 = math.rsqrt %226 : vector<4x1xf32>
    %228 = arith.mulf %227, %11 : vector<4x1xf32>
    %229 = vector.broadcast %228 : vector<4x1xf32> to vector<4x2xf32>
    %230 = arith.mulf %218, %229 : vector<4x2xf32>
    %231 = arith.mulf %207, %230 : vector<4x2xf32>
    %232 = vector.broadcast %12 : vector<4x1xf32> to vector<4x2xf32>
    %233 = arith.subf %232, %231 : vector<4x2xf32>
    %cst_48 = arith.constant dense<0.000000e+00> : vector<4x256xf32>
    %234 = tpu.matmul %230, %37, %cst_48 {dimension_numbers = #tpu.dot_dimension_numbers<[1], [0], [0], [1], [0, 0, 1, 1], [], []>} : vector<4x2xf32>, vector<2x256xf32>, vector<4x256xf32> -> vector<4x256xf32>
    %cst_49 = arith.constant dense<0.000000e+00> : vector<4x256xf32>
    %235 = tpu.matmul %233, %37, %cst_49 {dimension_numbers = #tpu.dot_dimension_numbers<[1], [0], [0], [1], [0, 0, 1, 1], [], []>} : vector<4x2xf32>, vector<2x256xf32>, vector<4x256xf32> -> vector<4x256xf32>
    %236 = arith.mulf %204, %234 : vector<4x256xf32>
    %237 = arith.addf %236, %235 : vector<4x256xf32>
    %cst_50 = arith.constant 0.000000e+00 : f32
    %238 = vector.broadcast %cst_50 : f32 to vector<4x256xf32>
    %239 = arith.maximumf %237, %238 : vector<4x256xf32>
    %240 = vector.extract_strided_slice %6 {offsets = [0, 0], sizes = [1, 1], strides = [1, 1]} : vector<1x4xf32> to vector<1x1xf32>
    %241 = vector.extract_strided_slice %239 {offsets = [0, 0], sizes = [1, 256], strides = [1, 1]} : vector<4x256xf32> to vector<1x256xf32>
    %242 = vector.broadcast %240 : vector<1x1xf32> to vector<1x256xf32>
    %243 = arith.mulf %242, %241 : vector<1x256xf32>
    %244 = vector.extract_strided_slice %6 {offsets = [0, 1], sizes = [1, 1], strides = [1, 1]} : vector<1x4xf32> to vector<1x1xf32>
    %245 = vector.extract_strided_slice %239 {offsets = [1, 0], sizes = [1, 256], strides = [1, 1]} : vector<4x256xf32> to vector<1x256xf32>
    %246 = vector.broadcast %244 : vector<1x1xf32> to vector<1x256xf32>
    %247 = arith.mulf %246, %245 : vector<1x256xf32>
    %248 = arith.addf %243, %247 : vector<1x256xf32>
    %249 = vector.extract_strided_slice %6 {offsets = [0, 2], sizes = [1, 1], strides = [1, 1]} : vector<1x4xf32> to vector<1x1xf32>
    %250 = vector.extract_strided_slice %239 {offsets = [2, 0], sizes = [1, 256], strides = [1, 1]} : vector<4x256xf32> to vector<1x256xf32>
    %251 = vector.broadcast %249 : vector<1x1xf32> to vector<1x256xf32>
    %252 = arith.mulf %251, %250 : vector<1x256xf32>
    %253 = arith.addf %248, %252 : vector<1x256xf32>
    %254 = vector.extract_strided_slice %6 {offsets = [0, 3], sizes = [1, 1], strides = [1, 1]} : vector<1x4xf32> to vector<1x1xf32>
    %255 = vector.extract_strided_slice %239 {offsets = [3, 0], sizes = [1, 256], strides = [1, 1]} : vector<4x256xf32> to vector<1x256xf32>
    %256 = vector.broadcast %254 : vector<1x1xf32> to vector<1x256xf32>
    %257 = arith.mulf %256, %255 : vector<1x256xf32>
    %258 = arith.addf %253, %257 : vector<1x256xf32>
    %259 = vector.broadcast %13 : vector<1x1xf32> to vector<1x256xf32>
    %260 = arith.addf %258, %259 : vector<1x256xf32>
    %c0_51 = arith.constant 0 : index
    %c0_52 = arith.constant 0 : index
    %261 = vector.load %arg4[%c0_51, %c0_52] : memref<1x256xf32, #tpu.memory_space<vmem>>, vector<1x256xf32>
    tpu.vector_store %arg4[%c0_51, %c0_52], %260 {strides = array<i32>} : memref<1x256xf32, #tpu.memory_space<vmem>>, vector<1x256xf32>,
    return
  }
}

</mosaic_0001>

<bundles_post_ra>
// kernel: tpu_custom_call.1
= control target key start
LH: loop header
LB: loop body
LE: loop exit
PB: predicated region body
PF: predicated region fallthrough
CT: control target
= control target key end

     0   :  { %vm244_vm0 = vcmask 1043456   ;;  %v4171_v1 = vlaneseq  ;;  %v4176_v3 = vmov 0.0   ;;  %vm4152_vm1 = vcmask 31744   ;;  %s4147_s0 = inlined_call_operand.vmem [shape: f32[4,256], index: 0, kind: input, shape index: {}]   ;;  %s4148_s1 = inlined_call_operand.vmem [shape: f32[64,4], index: 1, kind: input, shape index: {}]   ;;  %s4149_s2 = inlined_call_operand.vmem [shape: f32[21,64], index: 2, kind: input, shape index: {}]   ;;  %s4150_s3 = inlined_call_operand.vmem [shape: f32[85,2], index: 3, kind: input, shape index: {}]   ;;  %s4151_s4 = inlined_call_operand.hbm [shape: f32[1,256], index: 4, kind: output, shape index: {}]  }
   0x1   :  { %v18_v0 = vld [vmem:[%s4147_s0] sm:$0xff]  ;;  %313 = vmatprep.mubr.f32.mxu0 %v4176_v3 }
   0x2   :  { %v218_v2 = vcombine.high %v18_v0, %v18_v0  ;;  %v19_v4 = vld [vmem:[%s4148_s1] sm:$0xff]  ;;  %v3154_v5 = vshrl.u32 %v4171_v1, 7  ;;  %v3157_v6 = vand.u32 127, %v4171_v1 }
   0x4   :  { %4200 = vst [vmem:[#allocation5_spill] sm:$0xff] %v3154_v5  ;;  %2281 = vmatprep.subr.msk.mxu0 %vm244_vm0, %v218_v2 }
   0x5   :  { %9 = vsyncpa [#allocation3], 0  ;;  %2282 = vmatpush1.msk.msra.mxu0 %vm244_vm0, %v18_v0  ;;  %v58_v7 = vadd.s32 128, %v3154_v5  ;;  %v59_v8 = vadd.s32 136, %v3154_v5  ;;  %v3162_v9 = vmul.u32 128, %v3157_v6  ;;  %v20_v10 = vld [vmem:[%s4148_s1 + $0x8] sm:$0xff] }
   0x6   :  { %2283 = vmatmul.mubr.msk.f32.vlgmr.msra.gmra.mrb[0].mxu0 %vm4152_vm1, %v19_v4  ;;  %v43_v12 = vadd.s32 8, %v3154_v5  ;;  %v60_v13 = vadd.s32 144, %v3154_v5  ;;  %v61_v14 = vadd.s32 152, %v3154_v5  ;;  %v21_v15 = vld [vmem:[%s4148_s1 + $0x10] sm:$0xff]  ;;  %v4201_v16 = vmov 0  ;;  %v22_v20 = vld [vmem:[%s4148_s1 + $0x18] sm:$0xff] }
   0x7   :  { %319 = vmatprep.mubr.f32.mxu0 %v4176_v3  ;;  %vm93_vm2 = vcmp.ge.s32.totalorder %v58_v7, %v3162_v9  ;;  %v3171_v11 = vadd.s32 128, %v3162_v9  ;;  %vm94_vm3 = vcmp.ge.s32.totalorder %v59_v8, %v3162_v9  ;;  %vm77_vm7 = vcmp.ge.s32.totalorder %v3154_v5, %v3162_v9  ;;  %v23_v26 = vld [vmem:[%s4148_s1 + $0x20] sm:$0xff]  ;;  %v24_v31 = vld [vmem:[%s4148_s1 + $0x28] sm:$0xff]  ;;  %v25_v35 = vld [vmem:[%s4148_s1 + $0x30] sm:$0xff] }
   0x8   :  { %vm78_vm10 = vcmp.ge.s32.totalorder %v43_v12, %v3162_v9  ;;  %v44_v17 = vadd.s32 16, %v3154_v5  ;;  %v4174_v18 = vmov 1.0|1.0   ;;  %vm95_vm14 = vcmp.ge.s32.totalorder %v60_v13, %v3162_v9  ;;  %v26_v41 = vld [vmem:[%s4148_s1 + $0x38] sm:$0xff] }
   0x9   :  { %vm126_vm4 = vcmp.lt.s32.totalorder %v58_v7, %v3171_v11  ;;  %vm127_vm5 = vcmp.lt.s32.totalorder %v59_v8, %v3171_v11  ;;  %vm110_vm8 = vcmp.lt.s32.totalorder %v3154_v5, %v3171_v11  ;;  %vm111_vm11 = vcmp.lt.s32.totalorder %v43_v12, %v3171_v11 }
   0xa   :  { %2284 = vmatmul.mubr.msk.f32.gmra.mrb[2].mxu0 %vm4152_vm1, %v20_v10  ;;  %vm158_vm6 = vmand %vm93_vm2, %vm126_vm4  ;;  %vm128_vm15 = vcmp.lt.s32.totalorder %v60_v13, %v3171_v11  ;;  %v45_v19 = vadd.s32 24, %v3154_v5  ;;  %vm96_vm2 = vcmp.ge.s32.totalorder %v61_v14, %v3162_v9  ;;  %v62_v22 = vadd.s32 160, %v3154_v5 }
   0xb   :  { %325 = vmatprep.mubr.f32.mxu0 %v4176_v3  ;;  %vm159_vm9 = vmand %vm94_vm3, %vm127_vm5  ;;  %vm129_vm3 = vcmp.lt.s32.totalorder %v61_v14, %v3171_v11  ;;  %v63_v23 = vadd.s32 168, %v3154_v5  ;;  %v46_v25 = vadd.s32 32, %v3154_v5  ;;  %v47_v27 = vadd.s32 40, %v3154_v5 }
   0xc   :  { %vm3190_vm12 = vmpackc.low %vm159_vm9, %vm158_vm6  ;;  %vm79_vm6 = vcmp.ge.s32.totalorder %v44_v17, %v3162_v9  ;;  %vm80_vm9 = vcmp.ge.s32.totalorder %v45_v19, %v3162_v9  ;;  %v4208_v28 = vmov 0  ;;  %v64_v29 = vadd.s32 176, %v3154_v5 }
   0xd   :  { %v4202_v16 = vsel %vm3190_vm12, 4294967295, %v4201_v16  ;;  %2778 = vmatprep.subr.msk.bf16.mxu1 %vm3190_vm12, %v4174_v18  ;;  %vm142_vm13 = vmand %vm77_vm7, %vm110_vm8  ;;  %2810 = vmatprep.subr.msk.bf16.mxu0 %vm3190_vm12, %v4174_v18  ;;  %vm112_vm7 = vcmp.lt.s32.totalorder %v44_v17, %v3171_v11  ;;  %v65_v30 = vadd.s32 184, %v3154_v5  ;;  %v4210_v32 = vmov 0 }
   0xe   :  { %4203 = vst [vmem:[#allocation6_spill] sm:$0xff] %v4202_v16  ;;  %2285 = vmatmul.mubr.msk.f32.gmra.mrb[4].mxu0 %vm4152_vm1, %v21_v15  ;;  %vm143_vm0 = vmand %vm78_vm10, %vm111_vm11  ;;  %vm113_vm10 = vcmp.lt.s32.totalorder %v45_v19, %v3171_v11  ;;  %v48_v33 = vadd.s32 48, %v3154_v5  ;;  %v49_v34 = vadd.s32 56, %v3154_v5  ;;  %v66_v37 = vadd.s32 192, %v3154_v5 }
   0xf   :  { %331 = vmatprep.mubr.f32.mxu0 %v4176_v3  ;;  %vm3211_vm4 = vmpackc.low %vm143_vm0, %vm142_vm13  ;;  %v67_v38 = vadd.s32 200, %v3154_v5  ;;  %v4215_v39 = vmov 0  ;;  %v50_v40 = vadd.s32 64, %v3154_v5  ;;  %v51_v42 = vadd.s32 72, %v3154_v5 }
  0x10   :  { %2780 = vmatpush3.bf16.msk.msra.mxu1 %vm3211_vm4, %v4174_v18  ;;  %2812 = vmatpush3.bf16.msk.msra.mxu0 %vm3211_vm4, %v4174_v18  ;;  %vm160_vm5 = vmand %vm95_vm14, %vm128_vm15  ;;  %vm97_vm14 = vcmp.ge.s32.totalorder %v62_v22, %v3162_v9  ;;  %vm130_vm15 = vcmp.lt.s32.totalorder %v62_v22, %v3171_v11  ;;  %v4217_v43 = vmov 0  ;;  %v68_v44 = vadd.s32 208, %v3154_v5 }
  0x11   :  { %vm161_vm8 = vmand %vm96_vm2, %vm129_vm3  ;;  %vm98_vm2 = vcmp.ge.s32.totalorder %v63_v23, %v3162_v9  ;;  %vm131_vm3 = vcmp.lt.s32.totalorder %v63_v23, %v3171_v11  ;;  %v69_v45 = vadd.s32 216, %v3154_v5  ;;  %v4220_v46 = vmov 0 }
  0x12   :  { %2286 = vmatmul.mubr.msk.f32.gmra.mrb[6].mxu0 %vm4152_vm1, %v22_v20  ;;  %vm3228_vm11 = vmpackc.low %vm161_vm8, %vm160_vm5  ;;  %vm114_vm8 = vcmp.lt.s32.totalorder %v46_v25, %v3171_v11  ;;  %v52_v47 = vadd.s32 80, %v3154_v5  ;;  %v53_v48 = vadd.s32 88, %v3154_v5  ;;  %v4222_v49 = vmov 0 }
  0x13   :  { %337 = vmatprep.mubr.f32.mxu0 %v4176_v3  ;;  %2782 = vmatprep.subr.msk.bf16.mxu1 %vm3228_vm11, %v4174_v18  ;;  %vm144_vm13 = vmand %vm79_vm6, %vm112_vm7  ;;  %vm81_vm7 = vcmp.ge.s32.totalorder %v46_v25, %v3162_v9  ;;  %v70_v50 = vadd.s32 224, %v3154_v5  ;;  %v71_v51 = vadd.s32 232, %v3154_v5  ;;  %v4224_v52 = vmov 0 }
  0x14   :  { %vm145_vm0 = vmand %vm80_vm9, %vm113_vm10  ;;  %2814 = vmatprep.subr.msk.bf16.mxu0 %vm3228_vm11, %v4174_v18  ;;  %vm82_vm10 = vcmp.ge.s32.totalorder %v47_v27, %v3162_v9  ;;  %v54_v53 = vadd.s32 96, %v3154_v5  ;;  %v55_v54 = vadd.s32 104, %v3154_v5  ;;  %v4226_v55 = vmov 0 }
  0x15   :  { %vm3248_vm5 = vmpackc.low %vm145_vm0, %vm144_vm13  ;;  %vm115_vm13 = vcmp.lt.s32.totalorder %v47_v27, %v3171_v11  ;;  %vm99_vm0 = vcmp.ge.s32.totalorder %v64_v29, %v3162_v9  ;;  %v72_v56 = vadd.s32 240, %v3154_v5  ;;  %v73_v57 = vadd.s32 248, %v3154_v5 }
  0x16   :  { %v4209_v28 = vsel %vm3248_vm5, 4294967295, %v4208_v28  ;;  %2287 = vmatmul.mubr.msk.f32.gmra.mrb[8].mxu0 %vm4152_vm1, %v23_v26  ;;  %2784 = vmatpush3.bf16.msk.msra.mxu1 %vm3248_vm5, %v4174_v18  ;;  %vm162_vm6 = vmand %vm97_vm14, %vm130_vm15  ;;  %v4228_v58 = vmov 0  ;;  %v4230_v59 = vmov 0  ;;  %v4232_v60 = vmov 0 }
  0x17   :  { %343 = vmatprep.mubr.f32.mxu0 %v4176_v3  ;;  %2816 = vmatpush3.bf16.msk.msra.mxu0 %vm3248_vm5, %v4174_v18  ;;  %vm163_vm9 = vmand %vm98_vm2, %vm131_vm3  ;;  %vm132_vm2 = vcmp.lt.s32.totalorder %v64_v29, %v3171_v11  ;;  %v56_v61 = vadd.s32 112, %v3154_v5  ;;  %v57_v62 = vadd.s32 120, %v3154_v5  ;;  %v4234_v63 = vmov 0 }
  0x18   :  { %vm3269_vm14 = vmpackc.low %vm163_vm9, %vm162_vm6  ;;  %vm100_vm6 = vcmp.ge.s32.totalorder %v65_v30, %v3162_v9  ;;  %vm133_vm9 = vcmp.lt.s32.totalorder %v65_v30, %v3171_v11 }
  0x19   :  { %v4211_v32 = vsel %vm3269_vm14, 4294967295, %v4210_v32  ;;  %2786 = vmatprep.subr.msk.bf16.mxu1 %vm3269_vm14, %v4174_v18  ;;  %vm146_vm15 = vmand %vm81_vm7, %vm114_vm8  ;;  %2818 = vmatprep.subr.msk.bf16.mxu0 %vm3269_vm14, %v4174_v18  ;;  %vm4214_vm14 = vcmask 31744  }
  0x1a   :  { %2288 = vmatmul.mubr.msk.f32.gmra.mrb[10].mxu0 %vm4152_vm1, %v24_v31  ;;  %vm147_vm3 = vmand %vm82_vm10, %vm115_vm13  ;;  %vm83_vm10 = vcmp.ge.s32.totalorder %v48_v33, %v3162_v9  ;;  %vm116_vm13 = vcmp.lt.s32.totalorder %v48_v33, %v3171_v11  ;;  %vm117_vm1 = vcmp.lt.s32.totalorder %v49_v34, %v3171_v11 }
  0x1b   :  { %349 = vmatprep.mubr.f32.mxu0 %v4176_v3  ;;  %vm3290_vm7 = vmpackc.low %vm147_vm3, %vm146_vm15  ;;  %vm84_vm3 = vcmp.ge.s32.totalorder %v49_v34, %v3162_v9 }
  0x1c   :  { %2788 = vmatpush3.bf16.msk.msra.mxu1 %vm3290_vm7, %v4174_v18  ;;  %2820 = vmatpush3.bf16.msk.msra.mxu0 %vm3290_vm7, %v4174_v18  ;;  %vm164_vm8 = vmand %vm99_vm0, %vm132_vm2  ;;  %vm101_vm2 = vcmp.ge.s32.totalorder %v66_v37, %v3162_v9 }
  0x1d   :  { %vm165_vm15 = vmand %vm100_vm6, %vm133_vm9  ;;  %vm102_vm9 = vcmp.ge.s32.totalorder %v67_v38, %v3162_v9 }
  0x1e   :  { %2289 = vmatmul.mubr.msk.f32.gmra.mrb[12].mxu0 %vm4214_vm14, %v25_v35  ;;  %vm3307_vm5 = vmpackc.low %vm165_vm15, %vm164_vm8  ;;  %vm134_vm14 = vcmp.lt.s32.totalorder %v66_v37, %v3171_v11  ;;  %vm135_vm8 = vcmp.lt.s32.totalorder %v67_v38, %v3171_v11 }
  0x1f   :  { %v4216_v39 = vsel %vm3307_vm5, 4294967295, %v4215_v39  ;;  %355 = vmatprep.mubr.f32.mxu0 %v4176_v3  ;;  %2790 = vmatprep.subr.msk.bf16.mxu1 %vm3307_vm5, %v4174_v18  ;;  %vm148_vm0 = vmand %vm83_vm10, %vm116_vm13  ;;  %vm4219_vm10 = vcmask 31744   ;;  %vm85_vm13 = vcmp.ge.s32.totalorder %v50_v40, %v3162_v9 }
  0x20   :  { %vm149_vm6 = vmand %vm84_vm3, %vm117_vm1  ;;  %2822 = vmatprep.subr.msk.bf16.mxu0 %vm3307_vm5, %v4174_v18  ;;  %vm118_vm3 = vcmp.lt.s32.totalorder %v50_v40, %v3171_v11 }
  0x21   :  { %vm3327_vm15 = vmpackc.low %vm149_vm6, %vm148_vm0  ;;  %vm86_vm6 = vcmp.ge.s32.totalorder %v51_v42, %v3162_v9 }
  0x22   :  { %v4218_v43 = vsel %vm3327_vm15, 4294967295, %v4217_v43  ;;  %2290 = vmatmul.mubr.msk.f32.gmra.mrb[14].mxu0 %vm4219_vm10, %v26_v41  ;;  %2792 = vmatpush3.bf16.msk.msra.mxu1 %vm3327_vm15, %v4174_v18  ;;  %vm166_vm1 = vmand %vm101_vm2, %vm134_vm14  ;;  %vm119_vm10 = vcmp.lt.s32.totalorder %v51_v42, %v3171_v11  ;;  %vm103_vm14 = vcmp.ge.s32.totalorder %v68_v44, %v3162_v9 }
  0x23   :  { %2824 = vmatpush3.bf16.msk.msra.mxu0 %vm3327_vm15, %v4174_v18  ;;  %vm167_vm0 = vmand %vm102_vm9, %vm135_vm8  ;;  %vm136_vm9 = vcmp.lt.s32.totalorder %v68_v44, %v3171_v11 }
  0x24   :  { %vm3344_vm5 = vmpackc.low %vm167_vm0, %vm166_vm1  ;;  %vm104_vm1 = vcmp.ge.s32.totalorder %v69_v45, %v3162_v9  ;;  %vm137_vm0 = vcmp.lt.s32.totalorder %v69_v45, %v3171_v11  ;;  %v4172_v45 = vmov 1  }
  0x25   :  { %v4221_v46 = vsel %vm3344_vm5, 4294967295, %v4220_v46  ;;  %2794 = vmatprep.subr.msk.bf16.mxu1 %vm3344_vm5, %v4174_v18  ;;  %vm150_vm2 = vmand %vm85_vm13, %vm118_vm3  ;;  %2826 = vmatprep.subr.msk.bf16.mxu0 %vm3344_vm5, %v4174_v18  ;;  %vm87_vm3 = vcmp.ge.s32.totalorder %v52_v47, %v3162_v9 }
  0x26   :  { %vm151_vm8 = vmand %vm86_vm6, %vm119_vm10  ;;  %vm120_vm6 = vcmp.lt.s32.totalorder %v52_v47, %v3171_v11  ;;  %3006 = vset.pattern.permute.xlu1 %v4172_v45 }
  0x27   :  { %vm3360_vm15 = vmpackc.low %vm151_vm8, %vm150_vm2  ;;  %vm88_vm2 = vcmp.ge.s32.totalorder %v53_v48, %v3162_v9  ;;  %vm121_vm8 = vcmp.lt.s32.totalorder %v53_v48, %v3171_v11 }
  0x28   :  { %v4223_v49 = vsel %vm3360_vm15, 4294967295, %v4222_v49  ;;  %2796 = vmatpush3.bf16.msk.msra.mxu1 %vm3360_vm15, %v4174_v18  ;;  %2828 = vmatpush3.bf16.msk.msra.mxu0 %vm3360_vm15, %v4174_v18  ;;  %vm168_vm13 = vmand %vm103_vm14, %vm136_vm9  ;;  %vm105_vm9 = vcmp.ge.s32.totalorder %v70_v50, %v3162_v9 }
  0x29   :  { %vm169_vm10 = vmand %vm104_vm1, %vm137_vm0  ;;  %vm138_vm1 = vcmp.lt.s32.totalorder %v70_v50, %v3171_v11 }
  0x2a   :  { %vm3376_vm5 = vmpackc.low %vm169_vm10, %vm168_vm13  ;;  %vm106_vm13 = vcmp.ge.s32.totalorder %v71_v51, %v3162_v9  ;;  %vm139_vm10 = vcmp.lt.s32.totalorder %v71_v51, %v3171_v11 }
  0x2b   :  { %v4225_v52 = vsel %vm3376_vm5, 4294967295, %v4224_v52  ;;  %2798 = vmatprep.subr.msk.bf16.mxu1 %vm3376_vm5, %v4174_v18  ;;  %vm152_vm14 = vmand %vm87_vm3, %vm120_vm6  ;;  %2830 = vmatprep.subr.msk.bf16.mxu0 %vm3376_vm5, %v4174_v18  ;;  %vm89_vm6 = vcmp.ge.s32.totalorder %v54_v53, %v3162_v9 }
  0x2c   :  { %vm153_vm0 = vmand %vm88_vm2, %vm121_vm8  ;;  %vm122_vm2 = vcmp.lt.s32.totalorder %v54_v53, %v3171_v11 }
  0x2d   :  { %vm3392_vm15 = vmpackc.low %vm153_vm0, %vm152_vm14  ;;  %vm90_vm14 = vcmp.ge.s32.totalorder %v55_v54, %v3162_v9  ;;  %vm123_vm0 = vcmp.lt.s32.totalorder %v55_v54, %v3171_v11 }
  0x2e   :  { %v4227_v55 = vsel %vm3392_vm15, 4294967295, %v4226_v55  ;;  %2800 = vmatpush3.bf16.msk.msra.mxu1 %vm3392_vm15, %v4174_v18  ;;  %2832 = vmatpush3.bf16.msk.msra.mxu0 %vm3392_vm15, %v4174_v18  ;;  %vm170_vm3 = vmand %vm105_vm9, %vm138_vm1  ;;  %vm107_vm1 = vcmp.ge.s32.totalorder %v72_v56, %v3162_v9  ;;  %vm108_vm15 = vcmp.ge.s32.totalorder %v73_v57, %v3162_v9 }
  0x2f   :  { %vm171_vm8 = vmand %vm106_vm13, %vm139_vm10  ;;  %vm140_vm13 = vcmp.lt.s32.totalorder %v72_v56, %v3171_v11 }
  0x30   :  { %vm3408_vm5 = vmpackc.low %vm171_vm8, %vm170_vm3  ;;  %vm141_vm3 = vcmp.lt.s32.totalorder %v73_v57, %v3171_v11 }
  0x31   :  { %v4229_v58 = vsel %vm3408_vm5, 4294967295, %v4228_v58  ;;  %2802 = vmatprep.subr.msk.bf16.mxu1 %vm3408_vm5, %v4174_v18  ;;  %vm154_vm9 = vmand %vm89_vm6, %vm122_vm2  ;;  %2834 = vmatprep.subr.msk.bf16.mxu0 %vm3408_vm5, %v4174_v18 }
  0x32   :  { %vm155_vm10 = vmand %vm90_vm14, %vm123_vm0  ;;  %vm91_vm14 = vcmp.ge.s32.totalorder %v56_v61, %v3162_v9  ;;  %vm124_vm0 = vcmp.lt.s32.totalorder %v56_v61, %v3171_v11 }
  0x33   :  { %vm3422_vm8 = vmpackc.low %vm155_vm10, %vm154_vm9  ;;  %vm125_vm9 = vcmp.lt.s32.totalorder %v57_v62, %v3171_v11 }
  0x34   :  { %v4231_v59 = vsel %vm3422_vm8, 4294967295, %v4230_v59  ;;  %2804 = vmatpush3.bf16.msk.msra.mxu1 %vm3422_vm8, %v4174_v18  ;;  %2836 = vmatpush3.bf16.msk.msra.mxu0 %vm3422_vm8, %v4174_v18  ;;  %vm172_vm6 = vmand %vm107_vm1, %vm140_vm13 }
  0x35   :  { %vm173_vm2 = vmand %vm108_vm15, %vm141_vm3  ;;  %vm92_vm15 = vcmp.ge.s32.totalorder %v57_v62, %v3162_v9  ;;  %vm4194_vm3 = vcmask 15360  }
  0x36   :  { %vm3432_vm5 = vmpackc.low %vm173_vm2, %vm172_vm6 }
  0x37   :  { %v4233_v60 = vsel %vm3432_vm5, 4294967295, %v4232_v60  ;;  %2806 = vmatprep.subr.msk.bf16.mxu1 %vm3432_vm5, %v4174_v18  ;;  %2838 = vmatprep.subr.msk.bf16.mxu0 %vm3432_vm5, %v4174_v18  ;;  %vm156_vm1 = vmand %vm91_vm14, %vm124_vm0 }
  0x38   :  { %vm157_vm13 = vmand %vm92_vm15, %vm125_vm9  ;;  %vm4193_vm15 = vcmask 1041408  }
  0x39   :  { %vm3448_vm10 = vmpackc.low %vm157_vm13, %vm156_vm1  ;;  %vm4248_vm13 = vnez %v4209_v28 }
  0x3a   :  { %v4235_v63 = vsel %vm3448_vm10, 4294967295, %v4234_v63  ;;  %2808 = vmatpush3.bf16.msk.msra.mxu1 %vm3448_vm10, %v4174_v18  ;;  %2840 = vmatpush3.bf16.msk.msra.mxu0 %vm3448_vm10, %v4174_v18 }
  0xd9   :  { %v3458_v0 = vpop.f32.mrb[0].mxu0 }
  0xda   :  { %v3460_v2 = vpop.f32.mrb[1].mxu0  ;;  %v475_v7 = vmul.f32 %v3458_v0, %v3458_v0 }
  0xdb   :  { %v476_v4 = vmul.f32 %v3460_v2, %v3460_v2  ;;  %426 = vmatprep.mubr.f32.mxu1 %v3460_v2 }
  0xdc   :  { %427 = vmatmul.mubr.f32.vlgmr.msra.gmra.mrb[0].mxu1 %v3458_v0 }
  0xdd   :  { %v3468_v8 = vpop.f32.mrb[2].mxu0  ;;  %555 = vmatprep.mubr.f32.mxu0 %v476_v4 }
  0xde   :  { %v3470_v9 = vpop.f32.mrb[3].mxu0  ;;  %556 = vmatmul.mubr.f32.vlgmr.msra.gmra.mrb[16].mxu0 %v475_v7  ;;  %v477_v11 = vmul.f32 %v3468_v8, %v3468_v8 }
  0xdf   :  { %v478_v10 = vmul.f32 %v3470_v9, %v3470_v9  ;;  %431 = vmatprep.mubr.f32.mxu1 %v3470_v9 }
  0xe0   :  { %432 = vmatmul.mubr.f32.gmra.mrb[2].mxu1 %v3468_v8 }
  0xe1   :  { %v3478_v12 = vpop.f32.mrb[4].mxu0  ;;  %560 = vmatprep.mubr.f32.mxu0 %v478_v10 }
  0xe2   :  { %v3480_v13 = vpop.f32.mrb[5].mxu0  ;;  %561 = vmatmul.mubr.f32.gmra.mrb[18].mxu0 %v477_v11  ;;  %v479_v15 = vmul.f32 %v3478_v12, %v3478_v12 }
  0xe3   :  { %v480_v14 = vmul.f32 %v3480_v13, %v3480_v13  ;;  %436 = vmatprep.mubr.f32.mxu1 %v3480_v13 }
  0xe4   :  { %437 = vmatmul.mubr.f32.gmra.mrb[4].mxu1 %v3478_v12 }
  0xe5   :  { %v3488_v17 = vpop.f32.mrb[6].mxu0  ;;  %565 = vmatprep.mubr.f32.mxu0 %v480_v14 }
  0xe6   :  { %v3490_v19 = vpop.f32.mrb[7].mxu0  ;;  %566 = vmatmul.mubr.f32.gmra.mrb[20].mxu0 %v479_v15  ;;  %v481_v22 = vmul.f32 %v3488_v17, %v3488_v17 }
  0xe7   :  { %v482_v20 = vmul.f32 %v3490_v19, %v3490_v19  ;;  %441 = vmatprep.mubr.f32.mxu1 %v3490_v19 }
  0xe8   :  { %442 = vmatmul.mubr.f32.gmra.mrb[6].mxu1 %v3488_v17 }
  0xe9   :  { %v3498_v23 = vpop.f32.mrb[8].mxu0  ;;  %570 = vmatprep.mubr.f32.mxu0 %v482_v20 }
  0xea   :  { %v3500_v25 = vpop.f32.mrb[9].mxu0  ;;  %571 = vmatmul.mubr.f32.gmra.mrb[22].mxu0 %v481_v22  ;;  %v483_v27 = vmul.f32 %v3498_v23, %v3498_v23 }
  0xeb   :  { %4236 = vst [vmem:[#allocation7_spill] sm:$0xff] %v3500_v25  ;;  %v484_v26 = vmul.f32 %v3500_v25, %v3500_v25  ;;  %446 = vmatprep.mubr.f32.mxu1 %v3500_v25 }
  0xec   :  { %447 = vmatmul.mubr.f32.gmra.mrb[8].mxu1 %v3498_v23 }
  0xed   :  { %v3508_v29 = vpop.f32.mrb[10].mxu0  ;;  %575 = vmatprep.mubr.f32.mxu0 %v484_v26 }
  0xee   :  { %4237 = vst [vmem:[#allocation8_spill] sm:$0xff] %v3508_v29  ;;  %v3510_v30 = vpop.f32.mrb[11].mxu0  ;;  %576 = vmatmul.mubr.f32.gmra.mrb[24].mxu0 %v483_v27  ;;  %v485_v33 = vmul.f32 %v3508_v29, %v3508_v29 }
  0xef   :  { %4238 = vst [vmem:[#allocation9_spill] sm:$0xff] %v3510_v30  ;;  %v486_v31 = vmul.f32 %v3510_v30, %v3510_v30  ;;  %451 = vmatprep.mubr.f32.mxu1 %v3510_v30 }
  0xf0   :  { %452 = vmatmul.mubr.f32.gmra.mrb[10].mxu1 %v3508_v29 }
  0xf1   :  { %v3518_v34 = vpop.f32.mrb[12].mxu0  ;;  %580 = vmatprep.mubr.f32.mxu0 %v486_v31 }
  0xf2   :  { %4239 = vst [vmem:[#allocation10_spill] sm:$0xff] %v3518_v34  ;;  %v3520_v35 = vpop.f32.mrb[13].mxu0  ;;  %581 = vmatmul.mubr.f32.gmra.mrb[26].mxu0 %v485_v33  ;;  %v487_v38 = vmul.f32 %v3518_v34, %v3518_v34 }
  0xf3   :  { %4240 = vst [vmem:[#allocation11_spill] sm:$0xff] %v3520_v35  ;;  %v488_v37 = vmul.f32 %v3520_v35, %v3520_v35  ;;  %456 = vmatprep.mubr.f32.mxu1 %v3520_v35 }
  0xf4   :  { %457 = vmatmul.mubr.f32.gmra.mrb[12].mxu1 %v3518_v34 }
  0xf5   :  { %v3528_v40 = vpop.f32.mrb[14].mxu0  ;;  %585 = vmatprep.mubr.f32.mxu0 %v488_v37 }
  0xf6   :  { %4241 = vst [vmem:[#allocation12_spill] sm:$0xff] %v3528_v40  ;;  %v3530_v41 = vpop.f32.mrb[15].mxu0  ;;  %586 = vmatmul.mubr.f32.gmra.mrb[28].mxu0 %v487_v38  ;;  %v489_v44 = vmul.f32 %v3528_v40, %v3528_v40 }
  0xf7   :  { %4242 = vst [vmem:[#allocation13_spill] sm:$0xff] %v3530_v41  ;;  %v490_v42 = vmul.f32 %v3530_v41, %v3530_v41  ;;  %461 = vmatprep.mubr.f32.mxu1 %v3530_v41 }
  0xf8   :  { %462 = vmatmul.mubr.f32.gmra.mrb[14].mxu1 %v3528_v40 }
  0xf9   :  { %590 = vmatprep.mubr.f32.mxu0 %v490_v42  ;;  %917 = vmatprep.mubr.f32.mxu1 %v4176_v3 }
  0xfa   :  { %591 = vmatmul.mubr.f32.gmra.mrb[30].mxu0 %v489_v44 }
  0xfb   :  { %1054 = vmatprep.mubr.f32.mxu0 %v4176_v3 }
 0x1af   :  { %v2551_v47 = vpop.f32.mrb[0].mxu1 }
 0x1b0   :  { %v2552_v48 = vpop.f32.mrb[1].mxu1 }
 0x1b1   :  { %v2553_v50 = vadd.f32 %v2552_v48, %v2551_v47  ;;  %v2607_v51 = vpop.f32.mrb[16].mxu0 }
 0x1b2   :  { %v2608_v53 = vpop.f32.mrb[17].mxu0 }
 0x1b3   :  { %v3541_v54 = vmul.f32 0.0078125, %v2553_v50  ;;  %v2609_v56 = vadd.f32 %v2608_v53, %v2607_v51  ;;  %v2554_v57 = vpop.f32.mrb[2].mxu1 }
 0x1b4   :  { %v2555_v61 = vpop.f32.mrb[3].mxu1 }
 0x1b5   :  { %v604_v62 = vmul.f32 %v3541_v54, %v3541_v54  ;;  %v596_v4 = vmul.f32 0.0078125, %v2609_v56  ;;  %v2556_v7 = vadd.f32 %v2555_v61, %v2554_v57  ;;  %v2610_v10 = vpop.f32.mrb[18].mxu0 }
 0x1b6   :  { %v2611_v11 = vpop.f32.mrb[19].mxu0 }
 0x1b7   :  { %v612_v14 = vsub.f32 %v596_v4, %v604_v62  ;;  %v3545_v15 = vmul.f32 0.0078125, %v2556_v7  ;;  %v2612_v20 = vadd.f32 %v2611_v11, %v2610_v10  ;;  %v2557_v22 = vpop.f32.mrb[4].mxu1 }
 0x1b8   :  { %v2558_v26 = vpop.f32.mrb[5].mxu1 }
 0x1b9   :  { %v620_v27 = vmax.f32 %v612_v14, 0.0  ;;  %v605_v31 = vmul.f32 %v3545_v15, %v3545_v15  ;;  %v597_v33 = vmul.f32 0.0078125, %v2612_v20  ;;  %v2559_v37 = vadd.f32 %v2558_v26, %v2557_v22  ;;  %v2613_v38 = vpop.f32.mrb[20].mxu0 }
 0x1ba   :  { %v2614_v42 = vpop.f32.mrb[21].mxu0 }
 0x1bb   :  { %v628_v44 = vadd.f32 0.001, %v620_v27  ;;  %v613_v47 = vsub.f32 %v597_v33, %v605_v31  ;;  %v3549_v48 = vmul.f32 0.0078125, %v2559_v37  ;;  %v2615_v50 = vadd.f32 %v2614_v42, %v2613_v38  ;;  %v2560_v51 = vpop.f32.mrb[6].mxu1 }
 0x1bc   :  { %v2561_v53 = vpop.f32.mrb[7].mxu1 }
 0x1bd   :  { %3033 = vrsqrt.f32 %v628_v44  ;;  %v621_v56 = vmax.f32 %v613_v47, 0.0  ;;  %v606_v57 = vmul.f32 %v3549_v48, %v3549_v48  ;;  %v598_v61 = vmul.f32 0.0078125, %v2615_v50  ;;  %v2616_v62 = vpop.f32.mrb[22].mxu0 }
 0x1be   :  { %v2562_v4 = vadd.f32 %v2561_v53, %v2560_v51  ;;  %v2617_v7 = vpop.f32.mrb[23].mxu0 }
 0x1bf   :  { %v629_v10 = vadd.f32 0.001, %v621_v56  ;;  %v614_v11 = vsub.f32 %v598_v61, %v606_v57  ;;  %v2618_v14 = vadd.f32 %v2617_v7, %v2616_v62  ;;  %v2563_v20 = vpop.f32.mrb[8].mxu1 }
 0x1c0   :  { %v3553_v22 = vmul.f32 0.0078125, %v2562_v4  ;;  %v2564_v26 = vpop.f32.mrb[9].mxu1 }
 0x1c1   :  { %3035 = vrsqrt.f32 %v629_v10  ;;  %v622_v31 = vmax.f32 %v614_v11, 0.0  ;;  %v599_v33 = vmul.f32 0.0078125, %v2618_v14  ;;  %v2565_v37 = vadd.f32 %v2564_v26, %v2563_v20  ;;  %v2619_v38 = vpop.f32.mrb[24].mxu0 }
 0x1c2   :  { %v607_v42 = vmul.f32 %v3553_v22, %v3553_v22  ;;  %v2620_v44 = vpop.f32.mrb[25].mxu0 }
 0x1c3   :  { %v630_v47 = vadd.f32 0.001, %v622_v31  ;;  %v3557_v50 = vmul.f32 0.0078125, %v2565_v37  ;;  %v2621_v51 = vadd.f32 %v2620_v44, %v2619_v38  ;;  %v2566_v53 = vpop.f32.mrb[10].mxu1 }
 0x1c4   :  { %v615_v57 = vsub.f32 %v599_v33, %v607_v42  ;;  %v2567_v61 = vpop.f32.mrb[11].mxu1 }
 0x1c5   :  { %3037 = vrsqrt.f32 %v630_v47  ;;  %v608_v62 = vmul.f32 %v3557_v50, %v3557_v50  ;;  %v600_v4 = vmul.f32 0.0078125, %v2621_v51  ;;  %v2568_v7 = vadd.f32 %v2567_v61, %v2566_v53  ;;  %v2622_v10 = vpop.f32.mrb[26].mxu0 }
 0x1c6   :  { %v623_v11 = vmax.f32 %v615_v57, 0.0  ;;  %v2623_v14 = vpop.f32.mrb[27].mxu0 }
 0x1c7   :  { %v3561_v20 = vpop.eup %3033  ;;  %v616_v26 = vsub.f32 %v600_v4, %v608_v62  ;;  %v3563_v1 = vmul.f32 0.0078125, %v2568_v7  ;;  %v2624_v37 = vadd.f32 %v2623_v14, %v2622_v10  ;;  %v2569_v45 = vpop.f32.mrb[12].mxu1 }
 0x1c8   :  { %v631_v38 = vadd.f32 0.001, %v623_v11  ;;  %v2570_v44 = vpop.f32.mrb[13].mxu1  ;;  %v644_v33 = vmul.f32 %v3561_v20, %v620_v27 }
 0x1c9   :  { %v624_v42 = vmax.f32 %v616_v26, 0.0  ;;  %v609_v47 = vmul.f32 %v3563_v1, %v3563_v1  ;;  %v601_v51 = vmul.f32 0.0078125, %v2624_v37  ;;  %v2571_v53 = vadd.f32 %v2570_v44, %v2569_v45  ;;  %v2625_v57 = vpop.f32.mrb[28].mxu0 }
 0x1ca   :  { %3039 = vrsqrt.f32 %v631_v38  ;;  %v2626_v61 = vpop.f32.mrb[29].mxu0  ;;  %v652_v62 = vmul.f32 %v3561_v20, %v644_v33 }
 0x1cb   :  { %v3569_v4 = vpop.eup %3035  ;;  %v632_v7 = vadd.f32 0.001, %v624_v42  ;;  %v617_v10 = vsub.f32 %v601_v51, %v609_v47  ;;  %v3571_v14 = vmul.f32 0.0078125, %v2571_v53  ;;  %v2627_v18 = vadd.f32 %v2626_v61, %v2625_v57  ;;  %v2572_v27 = vpop.f32.mrb[14].mxu1 }
 0x1cc   :  { %v2573_v3 = vpop.f32.mrb[15].mxu1  ;;  %v661_v26 = vsel %vm4194_vm3, %v652_v62, 0.0  ;;  %v645_v41 = vmul.f32 %v3569_v4, %v621_v56 }
 0x1cd   :  { %3041 = vrsqrt.f32 %v632_v7  ;;  %v625_v45 = vmax.f32 %v617_v10, 0.0  ;;  %v610_v37 = vmul.f32 %v3571_v14, %v3571_v14  ;;  %v602_v38 = vmul.f32 0.0078125, %v2627_v18  ;;  %662 = vadd.xlane.f32.xlu0 %v661_v26  ;;  %v2628_v44 = vpop.f32.mrb[30].mxu0 }
 0x1ce   :  { %v2574_v33 = vadd.f32 %v2573_v3, %v2572_v27  ;;  %v2629_v40 = vpop.f32.mrb[31].mxu0  ;;  %v653_v47 = vmul.f32 %v3569_v4, %v645_v41 }
 0x1cf   :  { %v3578_v51 = vpop.eup %3037  ;;  %v633_v53 = vadd.f32 0.001, %v625_v45  ;;  %v618_v57 = vsub.f32 %v602_v38, %v610_v37  ;;  %v2630_v61 = vadd.f32 %v2629_v40, %v2628_v44 }
 0x1d0   :  { %v3580_v62 = vmul.f32 0.0078125, %v2574_v33  ;;  %v664_v56 = vsel %vm4194_vm3, %v653_v47, 0.0  ;;  %v646_v7 = vmul.f32 %v3578_v51, %v622_v31 }
 0x1d1   :  { %3043 = vrsqrt.f32 %v633_v53  ;;  %v626_v10 = vmax.f32 %v618_v57, 0.0  ;;  %v603_v18 = vmul.f32 0.0078125, %v2630_v61  ;;  %665 = vadd.xlane.f32.xlu0 %v664_v56 }
 0x1d2   :  { %v611_v3 = vmul.f32 %v3580_v62, %v3580_v62  ;;  %v654_v41 = vmul.f32 %v3578_v51, %v646_v7 }
 0x1d3   :  { %v634_v27 = vadd.f32 0.001, %v626_v10 }
 0x1d4   :  { %v3587_v26 = vpop.eup %3039  ;;  %v619_v37 = vsub.f32 %v603_v18, %v611_v3  ;;  %v667_v40 = vsel %vm4194_vm3, %v654_v41, 0.0 }
 0x1d5   :  { %3045 = vrsqrt.f32 %v634_v27  ;;  %668 = vadd.xlane.f32.xlu1 %v667_v40  ;;  %v647_v38 = vmul.f32 %v3587_v26, %v623_v11 }
 0x1d6   :  { %v627_v31 = vmax.f32 %v619_v37, 0.0 }
 0x1d7   :  { %v3591_v44 = vpop.eup %3041  ;;  %v655_v33 = vmul.f32 %v3587_v26, %v647_v38 }
 0x1d8   :  { %v635_v47 = vadd.f32 0.001, %v627_v31  ;;  %v648_v53 = vmul.f32 %v3591_v44, %v624_v42 }
 0x1d9   :  { %v670_v57 = vsel %vm4194_vm3, %v655_v33, 0.0 }
 0x1da   :  { %3047 = vrsqrt.f32 %v635_v47  ;;  %671 = vadd.xlane.f32.xlu1 %v670_v57  ;;  %v656_v61 = vmul.f32 %v3591_v44, %v648_v53  ;;  %v4180_v47 = vmov 0   ;;  %v31_v53 = vld [vmem:[%s4150_s3 + $0x8] sm:$0xff]  ;;  %v33_v57 = vld [vmem:[%s4150_s3 + $0x18] sm:$0xff] }
 0x1db   :  { %v3597_v56 = vpop.eup %3043  ;;  %3005 = vset.pattern.permute.xlu0 %v4180_v47 }
 0x1dc   :  { %v673_v7 = vsel %vm4194_vm3, %v656_v61, 0.0  ;;  %v649_v11 = vmul.f32 %v3597_v56, %v625_v45  ;;  %v206_v61 = vmul.u32 128, %v3154_v5 }
 0x1dd   :  { %674 = vadd.xlane.f32.xlu0 %v673_v7  ;;  %v207_v7 = vadd.s32 128, %v3157_v6 }
 0x1de   :  { %v657_v18 = vmul.f32 %v3597_v56, %v649_v11  ;;  %v210_v11 = vadd.s32 128, %v206_v61  ;;  %vm208_vm2 = vcmp.ge.s32.totalorder %v3157_v6, %v206_v61 }
 0x1df   :  { %v3602_v3 = vpop.eup %3045  ;;  %vm209_vm6 = vcmp.ge.s32.totalorder %v207_v7, %v206_v61 }
 0x1e0   :  { %v676_v41 = vsel %vm4194_vm3, %v657_v18, 0.0  ;;  %v650_v42 = vmul.f32 %v3602_v3, %v626_v10  ;;  %v30_v10 = vld [vmem:[%s4150_s3] sm:$0xff]  ;;  %vm212_vm14 = vcmp.lt.s32.totalorder %v207_v7, %v210_v11  ;;  %vm211_vm0 = vcmp.lt.s32.totalorder %v3157_v6, %v210_v11 }
 0x1e1   :  { %677 = vadd.xlane.f32.xlu1 %v676_v41  ;;  %vm214_vm9 = vmand %vm209_vm6, %vm212_vm14  ;;  %v4243_v18 = vmov 0.0   ;;  %v4245_v6 = vmov 1.0|1.0   ;;  %vm4249_vm6 = vnez %v4211_v32  ;;  %vm4251_vm14 = vnez %v4218_v43 }
 0x1e2   :  { %v658_v27 = vmul.f32 %v3602_v3, %v650_v42  ;;  %v3632_v41 = vsel %vm214_vm9, 1.0, %v4243_v18  ;;  %vm213_vm1 = vmand %vm208_vm2, %vm211_vm0  ;;  %vm4250_vm2 = vnez %v4216_v39  ;;  %vm4252_vm0 = vnez %v4221_v46 }
 0x1e3   :  { %2355 = vmatprep.subr.msk.mxu1 %vm4193_vm15, %v3632_v41  ;;  %v3637_v42 = vsel %vm213_vm1, 1.0, %v4243_v18  ;;  %2365 = vmatprep.subr.msk.mxu0 %vm4193_vm15, %v3632_v41  ;;  %vm4253_vm9 = vnez %v4223_v49  ;;  %vm4254_vm1 = vnez %v4225_v52 }
 0x1e4   :  { %v3607_v37 = vpop.eup %3047  ;;  %v679_v40 = vsel %vm4194_vm3, %v658_v27, 0.0  ;;  %4244 = vst [vmem:[#allocation14_spill] sm:$0xff] %v3637_v42  ;;  %2356 = vmatpush1.msk.msra.mxu1 %vm4193_vm15, %v3637_v42  ;;  %2366 = vmatpush1.msk.msra.mxu0 %vm4193_vm15, %v3637_v42  ;;  %vm4255_vm15 = vnez %v4227_v55 }
 0x1e5   :  { %680 = vadd.xlane.f32.xlu0 %v679_v40  ;;  %v651_v38 = vmul.f32 %v3607_v37, %v627_v31  ;;  %v32_v31 = vld [vmem:[%s4150_s3 + $0x10] sm:$0xff]  ;;  %2858 = vmatprep.subr.msk.bf16.mxu0 %vm3190_vm12, %v4245_v6 }
 0x1e7   :  { %v659_v45 = vmul.f32 %v3607_v37, %v651_v38 }
 0x1e9   :  { %v682_v33 = vsel %vm4194_vm3, %v659_v45, 0.0 }
 0x1ea   :  { %683 = vadd.xlane.f32.xlu1 %v682_v33 }
 0x1fb   :  { %776 = vperm.xlu1 %3006, %v30_v10  }
 0x1ff   :  { %781 = vperm.xlu1 %3006, %v31_v53  }
 0x203   :  { %786 = vperm.xlu1 %3006, %v32_v31  }
 0x207   :  { %791 = vperm.xlu1 %3006, %v33_v57  }
 0x20b   :  { %3007 = vset.pattern.permute.xlu1 %v4180_v47 }
 0x25a   :  { %v663_v27 = vpop.xlane.xlu0 %662 }
 0x25b   :  { %v686_v40 = vmul.f32 0.5, %v663_v27 }
 0x25d   :  { %v694_v38 = vadd.f32 1e-05, %v686_v40 }
 0x25e   :  { %v666_v45 = vpop.xlane.xlu0 %665 }
 0x25f   :  { %3049 = vrsqrt.f32 %v694_v38  ;;  %v687_v33 = vmul.f32 0.5, %v666_v45 }
 0x261   :  { %v695_v61 = vadd.f32 1e-05, %v687_v33 }
 0x262   :  { %v669_v7 = vpop.xlane.xlu1 %668 }
 0x263   :  { %3051 = vrsqrt.f32 %v695_v61  ;;  %v688_v11 = vmul.f32 0.5, %v669_v7 }
 0x265   :  { %v696_v47 = vadd.f32 1e-05, %v688_v11 }
 0x267   :  { %3053 = vrsqrt.f32 %v696_v47  ;;  %v672_v5 = vpop.xlane.xlu1 %671 }
 0x268   :  { %v689_v35 = vmul.f32 0.5, %v672_v5 }
 0x269   :  { %v3050_v34 = vpop.eup %3049 }
 0x26a   :  { %v697_v42 = vadd.f32 1e-05, %v689_v35  ;;  %v675_v30 = vpop.xlane.xlu0 %674  ;;  %v710_v29 = vmul.f32 %v3050_v34, %v30_v10 }
 0x26b   :  { %v690_v16 = vmul.f32 0.5, %v675_v30 }
 0x26c   :  { %3055 = vrsqrt.f32 %v697_v42  ;;  %720 = vperm.xlu0 %3005, %v710_v29  }
 0x26d   :  { %v3052_v27 = vpop.eup %3051  ;;  %v698_v40 = vadd.f32 1e-05, %v690_v16  ;;  %v34_v16 = vld [vmem:[%s4150_s3 + $0x20] sm:$0xff] }
 0x26e   :  { %v678_v25 = vpop.xlane.xlu1 %677  ;;  %v711_v38 = vmul.f32 %v3052_v27, %v31_v53 }
 0x26f   :  { %3057 = vrsqrt.f32 %v698_v40  ;;  %v691_v45 = vmul.f32 0.5, %v678_v25 }
 0x270   :  { %725 = vperm.xlu1 %3007, %v711_v38   ;;  %v4246_v38 = vmov 1  }
 0x271   :  { %v3054_v33 = vpop.eup %3053  ;;  %v699_v61 = vadd.f32 1e-05, %v691_v45 }
 0x272   :  { %v681_v7 = vpop.xlane.xlu0 %680  ;;  %v712_v47 = vmul.f32 %v3054_v33, %v32_v31  ;;  %v35_v31 = vld [vmem:[%s4150_s3 + $0x28] sm:$0xff]  ;;  %v37_v33 = vld [vmem:[%s4150_s3 + $0x38] sm:$0xff] }
 0x273   :  { %3059 = vrsqrt.f32 %v699_v61  ;;  %v692_v5 = vmul.f32 0.5, %v681_v7 }
 0x274   :  { %730 = vperm.xlu1 %3007, %v712_v47   ;;  %v4247_v47 = vmov 0  }
 0x275   :  { %v700_v35 = vadd.f32 1e-05, %v692_v5 }
 0x276   :  { %v3056_v11 = vpop.eup %3055 }
 0x277   :  { %3061 = vrsqrt.f32 %v700_v35  ;;  %v684_v30 = vpop.xlane.xlu1 %683  ;;  %v713_v34 = vmul.f32 %v3056_v11, %v33_v57  ;;  %v36_v57 = vld [vmem:[%s4150_s3 + $0x30] sm:$0xff] }
 0x278   :  { %v693_v29 = vmul.f32 0.5, %v684_v30 }
 0x279   :  { %v3058_v10 = vpop.eup %3057  ;;  %735 = vperm.xlu1 %3007, %v713_v34  }
 0x27a   :  { %v701_v25 = vadd.f32 1e-05, %v693_v29  ;;  %v714_v53 = vmul.f32 %v3058_v10, %v34_v16 }
 0x27b   :  { %v777_v5 = vpop.permute.xlu1 %776 }
 0x27c   :  { %3063 = vrsqrt.f32 %v701_v25 }
 0x27d   :  { %v3060_v42 = vpop.eup %3059  ;;  %740 = vperm.xlu1 %3007, %v714_v53  }
 0x27e   :  { %v715_v27 = vmul.f32 %v3060_v42, %v35_v31 }
 0x27f   :  { %v782_v35 = vpop.permute.xlu1 %781 }
 0x280   :  { %745 = vperm.xlu0 %3005, %v715_v27  }
 0x281   :  { %v3062_v40 = vpop.eup %3061  ;;  %3008 = vset.pattern.permute.xlu1 %v4246_v38 }
 0x282   :  { %796 = vperm.xlu1 %3008, %v34_v16   ;;  %v716_v45 = vmul.f32 %v3062_v40, %v36_v57 }
 0x283   :  { %v787_v11 = vpop.permute.xlu1 %786 }
 0x284   :  { %750 = vperm.xlu0 %3005, %v716_v45  }
 0x286   :  { %v3064_v61 = vpop.eup %3063  ;;  %801 = vperm.xlu1 %3008, %v35_v31  }
 0x287   :  { %v717_v7 = vmul.f32 %v3064_v61, %v37_v33  ;;  %v792_v30 = vpop.permute.xlu1 %791 }
 0x289   :  { %755 = vperm.xlu0 %3005, %v717_v7  }
 0x28a   :  { %806 = vperm.xlu1 %3008, %v36_v57  }
 0x28d   :  { %3009 = vset.pattern.permute.xlu0 %v4246_v38 }
 0x28e   :  { %811 = vperm.xlu0 %3009, %v37_v33   ;;  %3010 = vset.pattern.permute.xlu1 %v4247_v47 }
 0x292   :  { %3011 = vset.pattern.permute.xlu0 %v4247_v47 }
 0x2eb   :  { %v721_v34 = vpop.permute.xlu0 %720 }
 0x2ec   :  { %v758_v16 = vmul.f32 %v3561_v20, %v721_v34 }
 0x2ee   :  { %v766_v29 = vmul.f32 %v758_v16, %v3541_v54  ;;  %2357 = vmatmul.mubr.msk.f32.vlgmr.msra.gmra.mrb[16].mxu1 %vm4194_vm3, %v758_v16 }
 0x2ef   :  { %v726_v10 = vpop.permute.xlu1 %725  ;;  %923 = vmatprep.mubr.f32.mxu1 %v4243_v18 }
 0x2f0   :  { %v814_v25 = vsub.f32 %v777_v5, %v766_v29  ;;  %v759_v53 = vmul.f32 %v3569_v4, %v726_v10 }
 0x2f2   :  { %v767_v31 = vmul.f32 %v759_v53, %v3545_v15  ;;  %2358 = vmatmul.mubr.msk.f32.gmra.mrb[18].mxu1 %vm4194_vm3, %v759_v53  ;;  %2367 = vmatmul.mubr.msk.f32.vlgmr.msra.gmra.mrb[32].mxu0 %vm4194_vm3, %v814_v25 }
 0x2f3   :  { %v731_v42 = vpop.permute.xlu1 %730  ;;  %929 = vmatprep.mubr.f32.mxu1 %v4243_v18  ;;  %1060 = vmatprep.mubr.f32.mxu0 %v4243_v18 }
 0x2f4   :  { %v815_v54 = vsub.f32 %v782_v35, %v767_v31  ;;  %v760_v20 = vmul.f32 %v3578_v51, %v731_v42  ;;  %2860 = vmatpush3.bf16.msk.msra.mxu0 %vm3211_vm4, %v4245_v6 }
 0x2f5   :  { %2862 = vmatprep.subr.msk.bf16.mxu0 %vm3228_vm11, %v4245_v6 }
 0x2f6   :  { %v768_v15 = vmul.f32 %v760_v20, %v3549_v48  ;;  %2359 = vmatmul.mubr.msk.f32.gmra.mrb[20].mxu1 %vm4194_vm3, %v760_v20  ;;  %2368 = vmatmul.mubr.msk.f32.gmra.mrb[34].mxu0 %vm4194_vm3, %v815_v54 }
 0x2f7   :  { %935 = vmatprep.mubr.f32.mxu1 %v4243_v18  ;;  %1066 = vmatprep.mubr.f32.mxu0 %v4243_v18 }
 0x2f8   :  { %v816_v4 = vsub.f32 %v787_v11, %v768_v15  ;;  %v736_v51 = vpop.permute.xlu1 %735  ;;  %2864 = vmatpush3.bf16.msk.msra.mxu0 %vm4248_vm13, %v4245_v6 }
 0x2f9   :  { %v761_v27 = vmul.f32 %v3587_v26, %v736_v51  ;;  %2866 = vmatprep.subr.msk.bf16.mxu0 %vm4249_vm6, %v4245_v6 }
 0x2fa   :  { %2369 = vmatmul.mubr.msk.f32.gmra.mrb[36].mxu0 %vm4194_vm3, %v816_v4 }
 0x2fb   :  { %v769_v48 = vmul.f32 %v761_v27, %v3553_v22  ;;  %2360 = vmatmul.mubr.msk.f32.gmra.mrb[22].mxu1 %vm4194_vm3, %v761_v27  ;;  %1072 = vmatprep.mubr.f32.mxu0 %v4243_v18 }
 0x2fc   :  { %v741_v57 = vpop.permute.xlu1 %740  ;;  %941 = vmatprep.mubr.f32.mxu1 %v4243_v18  ;;  %2868 = vmatpush3.bf16.msk.msra.mxu0 %vm3290_vm7, %v4245_v6 }
 0x2fd   :  { %v817_v26 = vsub.f32 %v792_v30, %v769_v48  ;;  %v762_v40 = vmul.f32 %v3591_v44, %v741_v57  ;;  %2870 = vmatprep.subr.msk.bf16.mxu0 %vm4250_vm2, %v4245_v6 }
 0x2ff   :  { %2361 = vmatmul.mubr.msk.f32.gmra.mrb[24].mxu1 %vm4194_vm3, %v762_v40  ;;  %2370 = vmatmul.mubr.msk.f32.gmra.mrb[38].mxu0 %vm4194_vm3, %v817_v26  ;;  %v746_v22 = vpop.permute.xlu0 %745  ;;  %v770_v45 = vmul.f32 %v762_v40, %v3557_v50 }
 0x300   :  { %v763_v33 = vmul.f32 %v3597_v56, %v746_v22  ;;  %947 = vmatprep.mubr.f32.mxu1 %v4243_v18  ;;  %1078 = vmatprep.mubr.f32.mxu0 %v4243_v18 }
 0x301   :  { %v797_v61 = vpop.permute.xlu1 %796  ;;  %2872 = vmatpush3.bf16.msk.msra.mxu0 %vm4251_vm14, %v4245_v6 }
 0x302   :  { %v818_v44 = vsub.f32 %v797_v61, %v770_v45  ;;  %v771_v7 = vmul.f32 %v763_v33, %v3563_v1  ;;  %2874 = vmatprep.subr.msk.bf16.mxu0 %vm4252_vm0, %v4245_v6 }
 0x303   :  { %2362 = vmatmul.mubr.msk.f32.gmra.mrb[26].mxu1 %vm4194_vm3, %v763_v33  ;;  %v751_v50 = vpop.permute.xlu0 %750 }
 0x304   :  { %v764_v56 = vmul.f32 %v3602_v3, %v751_v50  ;;  %2371 = vmatmul.mubr.msk.f32.gmra.mrb[40].mxu0 %vm4194_vm3, %v818_v44  ;;  %953 = vmatprep.mubr.f32.mxu1 %v4243_v18 }
 0x305   :  { %v802_v5 = vpop.permute.xlu1 %801  ;;  %1084 = vmatprep.mubr.f32.mxu0 %v4243_v18  ;;  %2876 = vmatpush3.bf16.msk.msra.mxu0 %vm4253_vm9, %v4245_v6 }
 0x306   :  { %v819_v1 = vsub.f32 %v802_v5, %v771_v7  ;;  %v772_v35 = vmul.f32 %v764_v56, %v3571_v14  ;;  %2878 = vmatprep.subr.msk.bf16.mxu0 %vm4254_vm1, %v4245_v6  ;;  %vm4256_vm1 = vnez %v4229_v58 }
 0x307   :  { %2363 = vmatmul.mubr.msk.f32.gmra.mrb[28].mxu1 %vm4194_vm3, %v764_v56 }
 0x308   :  { %v756_v3 = vpop.permute.xlu0 %755  ;;  %2372 = vmatmul.mubr.msk.f32.gmra.mrb[42].mxu0 %vm4194_vm3, %v819_v1  ;;  %959 = vmatprep.mubr.f32.mxu1 %v4243_v18 }
 0x309   :  { %v765_v11 = vmul.f32 %v3607_v37, %v756_v3  ;;  %v807_v30 = vpop.permute.xlu1 %806  ;;  %1090 = vmatprep.mubr.f32.mxu0 %v4243_v18  ;;  %2880 = vmatpush3.bf16.msk.msra.mxu0 %vm4255_vm15, %v4245_v6 }
 0x30a   :  { %v820_v14 = vsub.f32 %v807_v30, %v772_v35  ;;  %2882 = vmatprep.subr.msk.bf16.mxu0 %vm4256_vm1, %v4245_v6  ;;  %vm4257_vm1 = vcmask 1041408  }
 0x30b   :  { %2364 = vmatmul.mubr.msk.f32.gmra.mrb[30].mxu1 %vm4194_vm3, %v765_v11  ;;  %v773_v34 = vmul.f32 %v765_v11, %v3580_v62 }
 0x30c   :  { %2373 = vmatmul.mubr.msk.f32.gmra.mrb[44].mxu0 %vm4194_vm3, %v820_v14  ;;  %1222 = vmatprep.mubr.f32.mxu1 %v4243_v18 }
 0x30d   :  { %v812_v37 = vpop.permute.xlu0 %811  ;;  %1096 = vmatprep.mubr.f32.mxu0 %v4243_v18  ;;  %2884 = vmatpush3.bf16.msk.msra.mxu0 %vm3422_vm8, %v4245_v6 }
 0x30e   :  { %v821_v16 = vsub.f32 %v812_v37, %v773_v34  ;;  %2886 = vmatprep.subr.msk.bf16.mxu0 %vm3432_vm5, %v4245_v6 }
 0x310   :  { %2374 = vmatmul.mubr.msk.f32.gmra.mrb[46].mxu0 %vm4194_vm3, %v821_v16  ;;  %v4258_v16 = vld [vmem:[#allocation7_spill] sm:$0xff]  ;;  %vm4267_vm3 = vnez %v4229_v58 }
 0x311   :  { %2888 = vmatpush3.bf16.msk.msra.mxu0 %vm3448_vm10, %v4245_v6 }
 0x312   :  { %2441 = vmatprep.subr.msk.mxu0 %vm4257_vm1, %v3632_v41  ;;  %vm1151_vm1 = vcmask 523264  }
 0x3c1   :  { %v919_v62 = vpop.f32.mrb[16].mxu1 }
 0x3c2   :  { %v1103_v29 = vmul.f32 %v919_v62, %v3458_v0  ;;  %v921_v10 = vpop.f32.mrb[17].mxu1 }
 0x3c3   :  { %v1104_v25 = vmul.f32 %v921_v10, %v3460_v2 }
 0x3c5   :  { %v925_v53 = vpop.f32.mrb[18].mxu1  ;;  %v1056_v31 = vpop.f32.mrb[32].mxu0 }
 0x3c6   :  { %v1105_v42 = vmul.f32 %v925_v53, %v3468_v8  ;;  %v1119_v54 = vadd.f32 %v1103_v29, %v1056_v31  ;;  %v927_v20 = vpop.f32.mrb[19].mxu1  ;;  %v1058_v15 = vpop.f32.mrb[33].mxu0 }
 0x3c7   :  { %v1106_v4 = vmul.f32 %v927_v20, %v3470_v9  ;;  %v1120_v51 = vadd.f32 %v1104_v25, %v1058_v15 }
 0x3c8   :  { %v1135_v45 = vmax.f32 %v1119_v54, 0.0  ;;  %v4259_v54 = vld [vmem:[#allocation8_spill] sm:$0xff] }
 0x3c9   :  { %v931_v27 = vpop.f32.mrb[20].mxu1  ;;  %v1062_v48 = vpop.f32.mrb[34].mxu0  ;;  %v1136_v61 = vmax.f32 %v1120_v51, 0.0  ;;  %v4260_v51 = vld [vmem:[#allocation9_spill] sm:$0xff] }
 0x3ca   :  { %v1107_v57 = vmul.f32 %v931_v27, %v3478_v12  ;;  %v1121_v26 = vadd.f32 %v1105_v42, %v1062_v48  ;;  %v933_v40 = vpop.f32.mrb[21].mxu1  ;;  %v1064_v0 = vpop.f32.mrb[35].mxu0 }
 0x3cb   :  { %v1108_v22 = vmul.f32 %v933_v40, %v3480_v13  ;;  %v1122_v2 = vadd.f32 %v1106_v4, %v1064_v0  ;;  %v4261_v40 = vld [vmem:[#allocation10_spill] sm:$0xff] }
 0x3cc   :  { %v1137_v33 = vmax.f32 %v1121_v26, 0.0 }
 0x3cd   :  { %v1138_v8 = vmax.f32 %v1122_v2, 0.0  ;;  %v1068_v44 = vpop.f32.mrb[36].mxu0 }
 0x3ce   :  { %v2843_v7 = vpack.c.bf16 %v1137_v33, %v1135_v45  ;;  %v937_v50 = vpop.f32.mrb[22].mxu1  ;;  %v1123_v56 = vadd.f32 %v1107_v57, %v1068_v44  ;;  %v1070_v9 = vpop.f32.mrb[37].mxu0  ;;  %v4262_v45 = vld [vmem:[#allocation11_spill] sm:$0xff] }
 0x3cf   :  { %v2841_v5 = vpack.c.bf16 %v1138_v8, %v1136_v61  ;;  %v1109_v1 = vmul.f32 %v937_v50, %v3488_v17  ;;  %v939_v35 = vpop.f32.mrb[23].mxu1  ;;  %v1124_v12 = vadd.f32 %v1108_v22, %v1070_v9 }
 0x3d0   :  { %v1110_v3 = vmul.f32 %v939_v35, %v3490_v19  ;;  %v1139_v10 = vmax.f32 %v1123_v56, 0.0 }
 0x3d1   :  { %2842 = vmatprep.subr.bf16.mxu1 %v2841_v5  ;;  %v1140_v53 = vmax.f32 %v1124_v12, 0.0 }
 0x3d2   :  { %v943_v11 = vpop.f32.mrb[24].mxu1  ;;  %v1074_v13 = vpop.f32.mrb[38].mxu0  ;;  %2844 = vmatpush1.bf16.msra.mxu1 %v2843_v7 }
 0x3d3   :  { %v1111_v30 = vmul.f32 %v943_v11, %v3498_v23  ;;  %v1125_v14 = vadd.f32 %v1109_v1, %v1074_v13  ;;  %v945_v34 = vpop.f32.mrb[25].mxu1  ;;  %v1076_v37 = vpop.f32.mrb[39].mxu0  ;;  %v4263_v1 = vld [vmem:[#allocation12_spill] sm:$0xff]  ;;  %v4264_v13 = vld [vmem:[#allocation13_spill] sm:$0xff] }
 0x3d4   :  { %v1112_v62 = vmul.f32 %v945_v34, %v4258_v16  ;;  %v1126_v29 = vadd.f32 %v1110_v3, %v1076_v37 }
 0x3d5   :  { %v1141_v25 = vmax.f32 %v1125_v14, 0.0 }
 0x3d6   :  { %v1142_v17 = vmax.f32 %v1126_v29, 0.0  ;;  %v949_v31 = vpop.f32.mrb[26].mxu1 }
 0x3d7   :  { %v2847_v42 = vpack.c.bf16 %v1141_v25, %v1139_v10  ;;  %v1113_v19 = vmul.f32 %v949_v31, %v4259_v54  ;;  %v951_v20 = vpop.f32.mrb[27].mxu1  ;;  %v1080_v15 = vpop.f32.mrb[40].mxu0 }
 0x3d8   :  { %v2845_v4 = vpack.c.bf16 %v1142_v17, %v1140_v53  ;;  %v1114_v27 = vmul.f32 %v951_v20, %v4260_v51  ;;  %v1127_v23 = vadd.f32 %v1111_v30, %v1080_v15  ;;  %v1082_v48 = vpop.f32.mrb[41].mxu0  ;;  %v27_v20 = vld [vmem:[%s4149_s2] sm:$0xff]  ;;  %v4265_v15 = vld [vmem:[#allocation6_spill] sm:$0xff] }
 0x3d9   :  { %v1128_v57 = vadd.f32 %v1112_v62, %v1082_v48 }
 0x3da   :  { %v955_v26 = vpop.f32.mrb[28].mxu1  ;;  %2846 = vmatprep.subr.bf16.mxu1 %v2845_v4  ;;  %v1143_v7 = vmax.f32 %v1127_v23, 0.0  ;;  %v28_v4 = vld [vmem:[%s4149_s2 + $0x8] sm:$0xff] }
 0x3db   :  { %v1115_v0 = vmul.f32 %v955_v26, %v4261_v40  ;;  %v957_v22 = vpop.f32.mrb[29].mxu1  ;;  %v1086_v2 = vpop.f32.mrb[42].mxu0  ;;  %2848 = vmatpush1.bf16.msra.mxu1 %v2847_v42  ;;  %v1144_v9 = vmax.f32 %v1128_v57, 0.0  ;;  %v4268_v26 = vld [vmem:[#allocation14_spill] sm:$0xff] }
 0x3dc   :  { %v1116_v33 = vmul.f32 %v957_v22, %v4262_v45  ;;  %v1129_v61 = vadd.f32 %v1113_v19, %v1086_v2  ;;  %v1088_v8 = vpop.f32.mrb[43].mxu0 }
 0x3dd   :  { %v1130_v44 = vadd.f32 %v1114_v27, %v1088_v8 }
 0x3de   :  { %v1145_v50 = vmax.f32 %v1129_v61, 0.0  ;;  %v961_v56 = vpop.f32.mrb[30].mxu1 }
 0x3df   :  { %v1146_v5 = vmax.f32 %v1130_v44, 0.0  ;;  %v1117_v35 = vmul.f32 %v961_v56, %v4263_v1  ;;  %v963_v12 = vpop.f32.mrb[31].mxu1  ;;  %v1092_v3 = vpop.f32.mrb[44].mxu0 }
 0x3e0   :  { %v2851_v11 = vpack.c.bf16 %v1145_v50, %v1143_v7  ;;  %v1118_v30 = vmul.f32 %v963_v12, %v4264_v13  ;;  %v1131_v14 = vadd.f32 %v1115_v0, %v1092_v3  ;;  %v1094_v34 = vpop.f32.mrb[45].mxu0 }
 0x3e1   :  { %v2849_v37 = vpack.c.bf16 %v1146_v5, %v1144_v9  ;;  %v1132_v16 = vadd.f32 %v1116_v33, %v1094_v34 }
 0x3e2   :  { %v1147_v53 = vmax.f32 %v1131_v14, 0.0 }
 0x3e3   :  { %v1098_v62 = vpop.f32.mrb[46].mxu0  ;;  %2850 = vmatprep.subr.bf16.mxu1 %v2849_v37  ;;  %v1148_v31 = vmax.f32 %v1132_v16, 0.0 }
 0x3e4   :  { %v1133_v29 = vadd.f32 %v1117_v35, %v1098_v62  ;;  %v1100_v10 = vpop.f32.mrb[47].mxu0  ;;  %2852 = vmatpush1.bf16.msra.mxu1 %v2851_v11 }
 0x3e5   :  { %v1134_v25 = vadd.f32 %v1118_v30, %v1100_v10 }
 0x3e6   :  { %v1149_v17 = vmax.f32 %v1133_v29, 0.0 }
 0x3e7   :  { %v1150_v42 = vmax.f32 %v1134_v25, 0.0 }
 0x3e8   :  { %v2855_v54 = vpack.c.bf16 %v1149_v17, %v1147_v53 }
 0x3e9   :  { %v2853_v19 = vpack.c.bf16 %v1150_v42, %v1148_v31 }
 0x3eb   :  { %2854 = vmatprep.subr.bf16.mxu1 %v2853_v19 }
 0x3ec   :  { %2856 = vmatpush1.bf16.msra.mxu1 %v2855_v54 }
 0x3ed   :  { %2890 = vmatprep.subr.msk.bf16.mxu1 %vm3190_vm12, %v4245_v6 }
 0x3ef   :  { %2375 = vmatmul.mubr.msk.f32.vlgmr.msra.gmra.mrb[32].mxu1 %vm1151_vm1, %v27_v20 }
 0x3f0   :  { %1228 = vmatprep.mubr.f32.mxu1 %v4243_v18  ;;  %2892 = vmatpush3.bf16.msk.msra.mxu1 %vm3211_vm4, %v4245_v6 }
 0x3f1   :  { %2894 = vmatprep.subr.msk.bf16.mxu1 %vm3228_vm11, %v4245_v6 }
 0x3f3   :  { %2376 = vmatmul.mubr.msk.f32.gmra.mrb[34].mxu1 %vm1151_vm1, %v28_v4  ;;  %vm4266_vm1 = vnez %v4225_v52 }
 0x3f4   :  { %2896 = vmatpush3.bf16.msk.msra.mxu1 %vm4248_vm13, %v4245_v6 }
 0x3f5   :  { %2898 = vmatprep.subr.msk.bf16.mxu1 %vm4249_vm6, %v4245_v6 }
 0x3f8   :  { %2900 = vmatpush3.bf16.msk.msra.mxu1 %vm3290_vm7, %v4245_v6 }
 0x3f9   :  { %2902 = vmatprep.subr.msk.bf16.mxu1 %vm4250_vm2, %v4245_v6 }
 0x3fc   :  { %2904 = vmatpush3.bf16.msk.msra.mxu1 %vm4251_vm14, %v4245_v6 }
 0x3fd   :  { %2906 = vmatprep.subr.msk.bf16.mxu1 %vm4252_vm0, %v4245_v6 }
 0x400   :  { %2908 = vmatpush3.bf16.msk.msra.mxu1 %vm4253_vm9, %v4245_v6 }
 0x401   :  { %2910 = vmatprep.subr.msk.bf16.mxu1 %vm4266_vm1, %v4245_v6 }
 0x404   :  { %2912 = vmatpush3.bf16.msk.msra.mxu1 %vm4255_vm15, %v4245_v6 }
 0x405   :  { %2914 = vmatprep.subr.msk.bf16.mxu1 %vm4267_vm3, %v4245_v6 }
 0x408   :  { %2916 = vmatpush3.bf16.msk.msra.mxu1 %vm3422_vm8, %v4245_v6 }
 0x409   :  { %2918 = vmatprep.subr.msk.bf16.mxu1 %vm3432_vm5, %v4245_v6 }
 0x40c   :  { %2920 = vmatpush3.bf16.msk.msra.mxu1 %vm3448_vm10, %v4245_v6  ;;  %vm4269_vm10 = vcmask 1041408  }
 0x40d   :  { %2954 = vmatprep.subr.msk.bf16.mxu1 %vm3190_vm12, %v4245_v6  ;;  %vm4270_vm12 = vmmov %vm4269_vm10 }
 0x4c2   :  { %v3832_v51 = vpop.f32.mrb[32].mxu1 }
 0x4c3   :  { %v3834_v27 = vpop.f32.mrb[33].mxu1  ;;  %v1312_v48 = vmul.f32 %v3832_v51, %v3832_v51 }
 0x4c4   :  { %v1313_v23 = vmul.f32 %v3834_v27, %v3834_v27  ;;  %1299 = vmatprep.mubr.f32.mxu0 %v3834_v27 }
 0x4c5   :  { %1300 = vmatmul.mubr.f32.vlgmr.msra.gmra.mrb[48].mxu0 %v3832_v51 }
 0x4c6   :  { %v3842_v57 = vpop.f32.mrb[34].mxu1  ;;  %1380 = vmatprep.mubr.f32.mxu1 %v1313_v23  ;;  %2442 = vmatpush1.msk.msra.mxu0 %vm4269_vm10, %v4268_v26  ;;  %vm4272_vm10 = vcmask 15360  }
 0x4c7   :  { %v3846_v40 = vpop.f32.mrb[35].mxu1  ;;  %1381 = vmatmul.mubr.f32.vlgmr.msra.gmra.mrb[36].mxu1 %v1312_v48  ;;  %2445 = vmatprep.subr.msk.mxu0 %vm4270_vm12, %v3632_v41  ;;  %v1314_v22 = vmul.f32 %v3842_v57, %v3842_v57  ;;  %vm4271_vm12 = vnez %v4235_v63 }
 0x4c8   :  { %v1315_v0 = vmul.f32 %v3846_v40, %v3846_v40  ;;  %1304 = vmatprep.mubr.f32.mxu0 %v3846_v40  ;;  %2956 = vmatpush3.bf16.msk.msra.mxu1 %vm3211_vm4, %v4245_v6 }
 0x4c9   :  { %1305 = vmatmul.mubr.f32.gmra.mrb[50].mxu0 %v3842_v57  ;;  %2958 = vmatprep.subr.msk.bf16.mxu1 %vm3228_vm11, %v4245_v6 }
 0x4ca   :  { %1385 = vmatprep.mubr.f32.mxu1 %v1315_v0  ;;  %1517 = vmatprep.mubr.f32.mxu0 %v4243_v18 }
 0x4cb   :  { %1386 = vmatmul.mubr.f32.gmra.mrb[38].mxu1 %v1314_v22 }
 0x4cc   :  { %2960 = vmatpush3.bf16.msk.msra.mxu1 %vm4248_vm13, %v4245_v6 }
 0x4cd   :  { %2962 = vmatprep.subr.msk.bf16.mxu1 %vm4249_vm6, %v4245_v6 }
 0x4d0   :  { %2964 = vmatpush3.bf16.msk.msra.mxu1 %vm3290_vm7, %v4245_v6 }
 0x4d1   :  { %2966 = vmatprep.subr.msk.bf16.mxu1 %vm4250_vm2, %v4245_v6 }
 0x4d4   :  { %2968 = vmatpush3.bf16.msk.msra.mxu1 %vm4251_vm14, %v4245_v6 }
 0x4d5   :  { %2970 = vmatprep.subr.msk.bf16.mxu1 %vm4252_vm0, %v4245_v6 }
 0x4d8   :  { %2972 = vmatpush3.bf16.msk.msra.mxu1 %vm4253_vm9, %v4245_v6 }
 0x4d9   :  { %2974 = vmatprep.subr.msk.bf16.mxu1 %vm4266_vm1, %v4245_v6 }
 0x4dc   :  { %2976 = vmatpush3.bf16.msk.msra.mxu1 %vm4255_vm15, %v4245_v6 }
 0x4dd   :  { %2978 = vmatprep.subr.msk.bf16.mxu1 %vm4267_vm3, %v4245_v6 }
 0x4e0   :  { %2980 = vmatpush3.bf16.msk.msra.mxu1 %vm3422_vm8, %v4245_v6 }
 0x4e1   :  { %2982 = vmatprep.subr.msk.bf16.mxu1 %vm3432_vm5, %v4245_v6  ;;  %vm4276_vm5 = vnez %v4265_v15 }
 0x4e4   :  { %2984 = vmatpush3.bf16.msk.msra.mxu1 %vm4271_vm12, %v4245_v6  ;;  %vm4273_vm12 = vmmov %vm4272_vm10 }
 0x598   :  { %v2663_v2 = vpop.f32.mrb[48].mxu0 }
 0x599   :  { %v2664_v45 = vpop.f32.mrb[49].mxu0 }
 0x59a   :  { %v2665_v33 = vadd.f32 %v2664_v45, %v2663_v2  ;;  %v2701_v61 = vpop.f32.mrb[36].mxu1  ;;  %v38_v2 = vld [vmem:[%s4150_s3 + $0x40] sm:$0xff] }
 0x59b   :  { %v2702_v8 = vpop.f32.mrb[37].mxu1 }
 0x59c   :  { %v3902_v44 = vmul.f32 0.0078125, %v2665_v33  ;;  %v2703_v7 = vadd.f32 %v2702_v8, %v2701_v61  ;;  %v2666_v50 = vpop.f32.mrb[50].mxu0  ;;  %v39_v61 = vld [vmem:[%s4150_s3 + $0x48] sm:$0xff] }
 0x59d   :  { %v2667_v56 = vpop.f32.mrb[51].mxu0 }
 0x59e   :  { %v1393_v9 = vmul.f32 %v3902_v44, %v3902_v44  ;;  %v1391_v5 = vmul.f32 0.0078125, %v2703_v7  ;;  %v2668_v1 = vadd.f32 %v2667_v56, %v2666_v50  ;;  %v2704_v35 = vpop.f32.mrb[38].mxu1  ;;  %v29_v50 = vld [vmem:[%s4149_s2 + $0x10] sm:$0x1f]  ;;  %v3105_v56 = vmov 6  }
 0x59f   :  { %v2705_v12 = vpop.f32.mrb[39].mxu1 }
 0x5a0   :  { %v1395_v3 = vsub.f32 %v1391_v5, %v1393_v9  ;;  %v3906_v11 = vmul.f32 0.0078125, %v2668_v1  ;;  %v2706_v13 = vadd.f32 %v2705_v12, %v2704_v35  ;;  %v3106_v9 = vmov 9  }
 0x5a1   :  { %v3107_v5 = vmov 2   ;;  %v3108_v1 = vmov 12   ;;  %v3109_v35 = vmov 3   ;;  %v3110_v12 = vmov 15  }
 0x5a2   :  { %v1397_v30 = vmax.f32 %v1395_v3, 0.0  ;;  %v1394_v14 = vmul.f32 %v3906_v11, %v3906_v11  ;;  %v1392_v34 = vmul.f32 0.0078125, %v2706_v13  ;;  %v3111_v3 = vmov 4  }
 0x5a3   :  { %v3112_v13 = vmov 5  }
 0x5a4   :  { %v1399_v37 = vadd.f32 0.001, %v1397_v30  ;;  %v1396_v16 = vsub.f32 %v1392_v34, %v1394_v14  ;;  %v3114_v14 = vmov 8   ;;  %v3115_v34 = vmov 10  }
 0x5a6   :  { %3065 = vrsqrt.f32 %v1399_v37  ;;  %v1398_v62 = vmax.f32 %v1396_v16, 0.0  ;;  %v3116_v37 = vmov 11   ;;  %v3117_v16 = vmov 13  }
 0x5a8   :  { %v1400_v29 = vadd.f32 0.001, %v1398_v62 }
 0x5aa   :  { %3067 = vrsqrt.f32 %v1400_v29 }
 0x5b0   :  { %v3910_v10 = vpop.eup %3065 }
 0x5b1   :  { %v1403_v25 = vmul.f32 %v3910_v10, %v1397_v30  ;;  %v3113_v30 = vmov 7  }
 0x5b3   :  { %v1405_v53 = vmul.f32 %v3910_v10, %v1403_v25 }
 0x5b4   :  { %v3914_v17 = vpop.eup %3067 }
 0x5b5   :  { %v1407_v31 = vsel %vm4272_vm10, %v1405_v53, 0.0  ;;  %v1404_v42 = vmul.f32 %v3914_v17, %v1398_v62  ;;  %v3118_v62 = vmov 14  }
 0x5b6   :  { %1408 = vadd.xlane.f32.xlu1 %v1407_v31 }
 0x5b7   :  { %v1406_v54 = vmul.f32 %v3914_v17, %v1404_v42 }
 0x5b9   :  { %v1410_v19 = vsel %vm4273_vm12, %v1406_v54, 0.0  ;;  %vm4274_vm12 = vmmov %vm4272_vm10  ;;  %vm4275_vm10 = vcmask 1041408  }
 0x5ba   :  { %1411 = vadd.xlane.f32.xlu0 %v1410_v19  ;;  %vm4277_vm8 = vmmov %vm4274_vm12 }
 0x643   :  { %v1409_v20 = vpop.xlane.xlu1 %1408 }
 0x644   :  { %v1413_v4 = vmul.f32 0.5, %v1409_v20 }
 0x646   :  { %v1415_v23 = vadd.f32 1e-05, %v1413_v4 }
 0x647   :  { %v1412_v48 = vpop.xlane.xlu0 %1411 }
 0x648   :  { %3069 = vrsqrt.f32 %v1415_v23  ;;  %v1414_v0 = vmul.f32 0.5, %v1412_v48 }
 0x64a   :  { %v1416_v22 = vadd.f32 1e-05, %v1414_v0 }
 0x64c   :  { %3071 = vrsqrt.f32 %v1416_v22 }
 0x652   :  { %v3070_v45 = vpop.eup %3069 }
 0x653   :  { %v1419_v33 = vmul.f32 %v3070_v45, %v38_v2 }
 0x655   :  { %1423 = vperm.xlu1 %3010, %v1419_v33  }
 0x656   :  { %v3072_v8 = vpop.eup %3071 }
 0x657   :  { %v1420_v7 = vmul.f32 %v3072_v8, %v39_v61 }
 0x659   :  { %3012 = vset.pattern.permute.xlu1 %v4246_v38  ;;  %1428 = vperm.xlu0 %3011, %v1420_v7  }
 0x65a   :  { %1437 = vperm.xlu1 %3012, %v38_v2  }
 0x65d   :  { %3019 = vset.pattern.permute.xlu0 %v3105_v56 }
 0x65e   :  { %1442 = vperm.xlu1 %3012, %v39_v61   ;;  %1721 = vperm.xlu0 %3019, %v29_v50  }
 0x662   :  { %3013 = vset.pattern.permute.xlu1 %v4247_v47  ;;  %3022 = vset.pattern.permute.xlu0 %v3106_v9 }
 0x663   :  { %1627 = vperm.xlu1 %3013, %v29_v50   ;;  %1769 = vperm.xlu0 %3022, %v29_v50  }
 0x667   :  { %3014 = vset.pattern.permute.xlu1 %v4246_v38  ;;  %3025 = vset.pattern.permute.xlu0 %v3108_v1 }
 0x668   :  { %1641 = vperm.xlu1 %3014, %v29_v50   ;;  %1817 = vperm.xlu0 %3025, %v29_v50  }
 0x66c   :  { %3015 = vset.pattern.permute.xlu1 %v3107_v5  ;;  %3028 = vset.pattern.permute.xlu0 %v3110_v12 }
 0x66d   :  { %1657 = vperm.xlu1 %3015, %v29_v50   ;;  %1865 = vperm.xlu0 %3028, %v29_v50  }
 0x671   :  { %3016 = vset.pattern.permute.xlu1 %v3109_v35  ;;  %3029 = vset.pattern.permute.xlu0 %v4247_v47 }
 0x672   :  { %1673 = vperm.xlu1 %3016, %v29_v50  }
 0x676   :  { %3017 = vset.pattern.permute.xlu1 %v3111_v3 }
 0x677   :  { %1689 = vperm.xlu1 %3017, %v29_v50  }
 0x67b   :  { %3018 = vset.pattern.permute.xlu1 %v3112_v13 }
 0x67c   :  { %1705 = vperm.xlu1 %3018, %v29_v50  }
 0x680   :  { %3020 = vset.pattern.permute.xlu1 %v3113_v30 }
 0x681   :  { %1737 = vperm.xlu1 %3020, %v29_v50  }
 0x685   :  { %3021 = vset.pattern.permute.xlu1 %v3114_v14 }
 0x686   :  { %1753 = vperm.xlu1 %3021, %v29_v50  }
 0x68a   :  { %3023 = vset.pattern.permute.xlu1 %v3115_v34 }
 0x68b   :  { %1785 = vperm.xlu1 %3023, %v29_v50  }
 0x68f   :  { %3024 = vset.pattern.permute.xlu1 %v3116_v37 }
 0x690   :  { %1801 = vperm.xlu1 %3024, %v29_v50  }
 0x694   :  { %3026 = vset.pattern.permute.xlu1 %v3117_v16 }
 0x695   :  { %1833 = vperm.xlu1 %3026, %v29_v50  }
 0x699   :  { %3027 = vset.pattern.permute.xlu1 %v3118_v62 }
 0x69a   :  { %1849 = vperm.xlu1 %3027, %v29_v50  }
 0x6d4   :  { %v1424_v29 = vpop.permute.xlu1 %1423 }
 0x6d5   :  { %v1431_v25 = vmul.f32 %v3910_v10, %v1424_v29 }
 0x6d7   :  { %2443 = vmatmul.mubr.msk.f32.vlgmr.msra.gmra.mrb[52].mxu0 %vm4274_vm12, %v1431_v25  ;;  %v1433_v42 = vmul.f32 %v1431_v25, %v3902_v44  ;;  %vm4278_vm12 = vmmov %vm4277_vm8 }
 0x6d8   :  { %v1429_v53 = vpop.permute.xlu0 %1428  ;;  %1523 = vmatprep.mubr.f32.mxu0 %v4243_v18  ;;  %2446 = vmatpush1.msk.msra.mxu0 %vm4275_vm10, %v4268_v26 }
 0x6d9   :  { %v1432_v31 = vmul.f32 %v3914_v17, %v1429_v53  ;;  %v1438_v54 = vpop.permute.xlu1 %1437  ;;  %2922 = vmatprep.subr.msk.bf16.mxu0 %vm4276_vm5, %v4245_v6  ;;  %vm4279_vm5 = vmmov %vm4277_vm8  ;;  %v4284_v17 = vld [vmem:[#allocation5_spill] sm:$0xff] }
 0x6da   :  { %v1445_v10 = vsub.f32 %v1438_v54, %v1433_v42  ;;  %v4013_v4 = vsub.s32 0, %v4284_v17  ;;  %v4026_v33 = vsub.s32 3, %v4284_v17  ;;  %v4029_v7 = vsub.s32 5, %v4284_v17 }
 0x6db   :  { %2444 = vmatmul.mubr.msk.f32.gmra.mrb[54].mxu0 %vm4277_vm8, %v1432_v31  ;;  %v1434_v19 = vmul.f32 %v1432_v31, %v3906_v11  ;;  %vm4283_vm8 = vmmov %vm4275_vm10  ;;  %v4039_v35 = vsub.s32 4, %v4284_v17  ;;  %v4048_v37 = vsub.s32 6, %v4284_v17  ;;  %v4054_v25 = vsub.s32 7, %v4284_v17 }
 0x6dc   :  { %1600 = vmatprep.mubr.f32.mxu0 %v4243_v18 }
 0x6dd   :  { %v1443_v20 = vpop.permute.xlu1 %1442 }
 0x6de   :  { %v1446_v44 = vsub.f32 %v1443_v20, %v1434_v19 }
 0x6df   :  { %2447 = vmatmul.mubr.msk.f32.vlgmr.msra.gmra.mrb[56].mxu0 %vm4278_vm12, %v1445_v10 }
 0x6e0   :  { %1606 = vmatprep.mubr.f32.mxu0 %v4243_v18  ;;  %2924 = vmatpush3.bf16.msk.msra.mxu0 %vm3211_vm4, %v4245_v6  ;;  %vm4280_vm4 = vnez %v4231_v59 }
 0x6e1   :  { %2926 = vmatprep.subr.msk.bf16.mxu0 %vm3228_vm11, %v4245_v6  ;;  %vm4281_vm11 = vnez %v4233_v60 }
 0x6e2   :  { %v3996_v21 = vpop.permute.xlu1 %1627 }
 0x6e3   :  { %2448 = vmatmul.mubr.msk.f32.gmra.mrb[58].mxu0 %vm4279_vm5, %v1446_v44 }
 0x6e4   :  { %2928 = vmatpush3.bf16.msk.msra.mxu0 %vm4248_vm13, %v4245_v6  ;;  %vm2031_vm13 = vcmask 11264  }
 0x6e5   :  { %2930 = vmatprep.subr.msk.bf16.mxu0 %vm4249_vm6, %v4245_v6  ;;  %vm4287_vm6 = vmmov %vm4279_vm5 }
 0x6e7   :  { %v3998_v24 = vpop.permute.xlu1 %1641 }
 0x6e8   :  { %2932 = vmatpush3.bf16.msk.msra.mxu0 %vm3290_vm7, %v4245_v6  ;;  %vm4282_vm7 = vnez %v4235_v63 }
 0x6e9   :  { %2934 = vmatprep.subr.msk.bf16.mxu0 %vm4250_vm2, %v4245_v6 }
 0x6ec   :  { %2936 = vmatpush3.bf16.msk.msra.mxu0 %vm4251_vm14, %v4245_v6  ;;  %v4000_v28 = vpop.permute.xlu1 %1657  ;;  %vm4289_vm14 = vmmov %vm4279_vm5 }
 0x6ed   :  { %2938 = vmatprep.subr.msk.bf16.mxu0 %vm4252_vm0, %v4245_v6 }
 0x6f0   :  { %2940 = vmatpush3.bf16.msk.msra.mxu0 %vm4253_vm9, %v4245_v6 }
 0x6f1   :  { %2942 = vmatprep.subr.msk.bf16.mxu0 %vm4266_vm1, %v4245_v6  ;;  %v4002_v32 = vpop.permute.xlu1 %1673 }
 0x6f4   :  { %2944 = vmatpush3.bf16.msk.msra.mxu0 %vm4255_vm15, %v4245_v6 }
 0x6f5   :  { %2946 = vmatprep.subr.msk.bf16.mxu0 %vm4267_vm3, %v4245_v6  ;;  %vm4285_vm3 = vmmov %vm4283_vm8 }
 0x6f6   :  { %v1690_v36 = vpop.permute.xlu1 %1689  ;;  %vm4286_vm15 = vmmov %vm4285_vm3 }
 0x6f7   :  { %vm4288_vm2 = vmmov %vm4285_vm3 }
 0x6f8   :  { %2948 = vmatpush3.bf16.msk.msra.mxu0 %vm4280_vm4, %v4245_v6 }
 0x6f9   :  { %2950 = vmatprep.subr.msk.bf16.mxu0 %vm4281_vm11, %v4245_v6 }
 0x6fb   :  { %v4005_v49 = vpop.permute.xlu1 %1705 }
 0x6fc   :  { %2952 = vmatpush3.bf16.msk.msra.mxu0 %vm4282_vm7, %v4245_v6 }
 0x6fd   :  { %2513 = vmatprep.subr.msk.mxu0 %vm4283_vm8, %v3632_v41 }
 0x700   :  { %v4010_v63 = vpop.permute.xlu1 %1737 }
 0x705   :  { %v1754_v61 = vpop.permute.xlu1 %1753 }
 0x70a   :  { %v1786_v10 = vpop.permute.xlu1 %1785 }
 0x7aa   :  { %v1519_v39 = vpop.f32.mrb[52].mxu0 }
 0x7ab   :  { %v1613_v43 = vmul.f32 %v1519_v39, %v3832_v51  ;;  %v1521_v46 = vpop.f32.mrb[53].mxu0  ;;  %v4016_v51 = vsub.s32 1, %v4284_v17 }
 0x7ac   :  { %v1614_v52 = vmul.f32 %v1521_v46, %v3834_v27  ;;  %v4019_v27 = vsub.s32 2, %v4284_v17 }
 0x7ae   :  { %v1525_v55 = vpop.f32.mrb[54].mxu0 }
 0x7af   :  { %v1615_v58 = vmul.f32 %v1525_v55, %v3842_v57  ;;  %v1527_v59 = vpop.f32.mrb[55].mxu0 }
 0x7b0   :  { %v1616_v60 = vmul.f32 %v1527_v59, %v3846_v40 }
 0x7b2   :  { %v1602_v6 = vpop.f32.mrb[56].mxu0 }
 0x7b3   :  { %v1617_v15 = vadd.f32 %v1613_v43, %v1602_v6  ;;  %v1604_v11 = vpop.f32.mrb[57].mxu0 }
 0x7b4   :  { %v1618_v23 = vadd.f32 %v1614_v52, %v1604_v11 }
 0x7b5   :  { %v1621_v48 = vmax.f32 %v1617_v15, 0.0 }
 0x7b6   :  { %v4021_v57 = vmax.f32 %v1618_v23, 0.0  ;;  %v1608_v0 = vpop.f32.mrb[58].mxu0 }
 0x7b7   :  { %v1619_v40 = vadd.f32 %v1615_v58, %v1608_v0  ;;  %v1610_v22 = vpop.f32.mrb[59].mxu0  ;;  %v1633_v2 = vrot.slane %v1621_v48, %v4013_v4  ;;  %v1647_v45 = vrot.slane %v1621_v48, %v4016_v51  ;;  %v1663_v1 = vrot.slane %v1621_v48, %v4019_v27  ;;  %v1722_v58 = vpop.permute.xlu0 %1721 }
 0x7b8   :  { %v1620_v8 = vadd.f32 %v1616_v60, %v1610_v22  ;;  %v1637_v50 = vrot.slane %v4021_v57, %v4013_v4  ;;  %v1651_v56 = vrot.slane %v4021_v57, %v4016_v51  ;;  %v1667_v13 = vrot.slane %v4021_v57, %v4019_v27 }
 0x7b9   :  { %v1638_v9 = vmul.f32 %v1633_v2, %v3996_v21  ;;  %v1652_v5 = vmul.f32 %v1647_v45, %v3998_v24  ;;  %v1668_v14 = vmul.f32 %v1663_v1, %v4000_v28  ;;  %v1679_v34 = vrot.slane %v1621_v48, %v4026_v33 }
 0x7ba   :  { %v1639_v12 = vmul.f32 %v1637_v50, %v3996_v21  ;;  %v1653_v3 = vmul.f32 %v1651_v56, %v3998_v24  ;;  %v1669_v62 = vmul.f32 %v1667_v13, %v4000_v28  ;;  %v1683_v29 = vrot.slane %v4021_v57, %v4026_v33  ;;  %v1802_v50 = vpop.permute.xlu1 %1801 }
 0x7bb   :  { %v1654_v30 = vadd.f32 %v1652_v5, %v1638_v9  ;;  %v1711_v53 = vrot.slane %v1621_v48, %v4029_v7  ;;  %v1684_v42 = vmul.f32 %v1679_v34, %v4002_v32  ;;  %v1695_v54 = vrot.slane %v1621_v48, %v4039_v35 }
 0x7bc   :  { %v1655_v16 = vadd.f32 %v1653_v3, %v1639_v12  ;;  %v1715_v19 = vrot.slane %v4021_v57, %v4029_v7  ;;  %v1685_v44 = vmul.f32 %v1683_v29, %v4002_v32  ;;  %v1699_v39 = vrot.slane %v4021_v57, %v4039_v35  ;;  %v1770_v12 = vpop.permute.xlu0 %1769 }
 0x7bd   :  { %v1670_v31 = vadd.f32 %v1668_v14, %v1654_v30  ;;  %v4064_v43 = vmax.f32 %v1619_v40, 0.0  ;;  %v4066_v46 = vmax.f32 %v1620_v8, 0.0  ;;  %v1700_v55 = vmul.f32 %v1695_v54, %v1690_v36 }
 0x7be   :  { %v1671_v20 = vadd.f32 %v1669_v62, %v1655_v16  ;;  %v1701_v60 = vmul.f32 %v1699_v39, %v1690_v36  ;;  %v1727_v6 = vrot.slane %v1621_v48, %v4048_v37  ;;  %v1731_v15 = vrot.slane %v4021_v57, %v4048_v37 }
 0x7bf   :  { %v1686_v52 = vadd.f32 %v1684_v42, %v1670_v31  ;;  %v1716_v23 = vmul.f32 %v1711_v53, %v4005_v49  ;;  %v1743_v0 = vrot.slane %v1621_v48, %v4054_v25  ;;  %v1717_v40 = vmul.f32 %v1715_v19, %v4005_v49  ;;  %v1834_v42 = vpop.permute.xlu1 %1833 }
 0x7c0   :  { %v1687_v59 = vadd.f32 %v1685_v44, %v1671_v20  ;;  %v1747_v2 = vrot.slane %v4021_v57, %v4054_v25  ;;  %v1732_v8 = vmul.f32 %v1727_v6, %v1722_v58  ;;  %v1759_v36 = vrot.slane %v4064_v43, %v4013_v4 }
 0x7c1   :  { %v1702_v11 = vadd.f32 %v1700_v55, %v1686_v52  ;;  %v1733_v9 = vmul.f32 %v1731_v15, %v1722_v58  ;;  %v1763_v5 = vrot.slane %v4066_v46, %v4013_v4  ;;  %v1748_v48 = vmul.f32 %v1743_v0, %v4010_v63  ;;  %v1818_v52 = vpop.permute.xlu0 %1817 }
 0x7c2   :  { %v1703_v22 = vadd.f32 %v1701_v60, %v1687_v59  ;;  %v1775_v49 = vrot.slane %v4064_v43, %v4016_v51  ;;  %v1749_v57 = vmul.f32 %v1747_v2, %v4010_v63  ;;  %v1779_v13 = vrot.slane %v4066_v46, %v4016_v51 }
 0x7c3   :  { %v1718_v45 = vadd.f32 %v1716_v23, %v1702_v11  ;;  %v1764_v14 = vmul.f32 %v1759_v36, %v1754_v61  ;;  %v1791_v34 = vrot.slane %v4064_v43, %v4019_v27  ;;  %v1765_v4 = vmul.f32 %v1763_v5, %v1754_v61 }
 0x7c4   :  { %v1719_v56 = vadd.f32 %v1717_v40, %v1703_v22  ;;  %v1795_v62 = vrot.slane %v4066_v46, %v4019_v27  ;;  %v1780_v53 = vmul.f32 %v1775_v49, %v1770_v12  ;;  %v1807_v31 = vrot.slane %v4064_v43, %v4026_v33  ;;  %v1850_v22 = vpop.permute.xlu1 %1849 }
 0x7c5   :  { %v1734_v1 = vadd.f32 %v1732_v8, %v1718_v45  ;;  %v1781_v54 = vmul.f32 %v1779_v13, %v1770_v12  ;;  %v1811_v51 = vrot.slane %v4066_v46, %v4026_v33  ;;  %v1796_v20 = vmul.f32 %v1791_v34, %v1786_v10 }
 0x7c6   :  { %v1735_v3 = vadd.f32 %v1733_v9, %v1719_v56  ;;  %v1823_v44 = vrot.slane %v4064_v43, %v4039_v35  ;;  %v1797_v39 = vmul.f32 %v1795_v62, %v1786_v10  ;;  %v1827_v27 = vrot.slane %v4066_v46, %v4039_v35 }
 0x7c7   :  { %v1750_v30 = vadd.f32 %v1748_v48, %v1734_v1  ;;  %v1839_v55 = vrot.slane %v4064_v43, %v4029_v7  ;;  %v1812_v59 = vmul.f32 %v1807_v31, %v1802_v50  ;;  %v1843_v60 = vrot.slane %v4066_v46, %v4029_v7 }
 0x7c8   :  { %v1751_v16 = vadd.f32 %v1749_v57, %v1735_v3  ;;  %v1813_v6 = vmul.f32 %v1811_v51, %v1802_v50  ;;  %v1828_v11 = vmul.f32 %v1823_v44, %v1818_v52  ;;  %v1855_v23 = vrot.slane %v4064_v43, %v4048_v37  ;;  %v1866_v50 = vpop.permute.xlu0 %1865 }
 0x7c9   :  { %v1766_v29 = vadd.f32 %v1764_v14, %v1750_v30  ;;  %v1829_v0 = vmul.f32 %v1827_v27, %v1818_v52  ;;  %v1859_v35 = vrot.slane %v4066_v46, %v4048_v37  ;;  %v1844_v40 = vmul.f32 %v1839_v55, %v1834_v42 }
 0x7ca   :  { %v1767_v63 = vadd.f32 %v1765_v4, %v1751_v16  ;;  %v1871_v45 = vrot.slane %v4064_v43, %v4054_v25  ;;  %v1845_v8 = vmul.f32 %v1843_v60, %v1834_v42  ;;  %v1875_v36 = vrot.slane %v4066_v46, %v4054_v25 }
 0x7cb   :  { %v1782_v19 = vadd.f32 %v1780_v53, %v1766_v29  ;;  %v1860_v9 = vmul.f32 %v1855_v23, %v1850_v22  ;;  %v1861_v1 = vmul.f32 %v1859_v35, %v1850_v22 }
 0x7cc   :  { %v1783_v61 = vadd.f32 %v1781_v54, %v1767_v63  ;;  %v1876_v49 = vmul.f32 %v1871_v45, %v1866_v50  ;;  %v1877_v3 = vmul.f32 %v1875_v36, %v1866_v50 }
 0x7cd   :  { %v1798_v58 = vadd.f32 %v1796_v20, %v1782_v19 }
 0x7ce   :  { %v1799_v33 = vadd.f32 %v1797_v39, %v1783_v61  ;;  %v40_v61 = vld [vmem:[%s4150_s3 + $0x50] sm:$0x1f]  ;;  %s3120_s3 = smov [#allocation2]  }
 0x7cf   :  { %v1814_v15 = vadd.f32 %v1812_v59, %v1798_v58  ;;  %s2273_s5 = sshll.u32 %s3120_s3, 4  ;;  %s2274_s5 = int_to_ptr.vmem [resolvable:$true] %s2273_s5 }
 0x7d0   :  { %v1815_v10 = vadd.f32 %v1813_v6, %v1799_v33  ;;  %s3077_s1 = scalar_lea.vmem %s2274_s5, 32  ;;  %p3082_p1 = scmp.lt.s32.totalorder %s2274_s5, %s2274_s5 }
 0x7d1   :  { %v1830_v2 = vadd.f32 %v1828_v11, %v1814_v15  ;;  %p3078_p0 = scmp.ne.s32.totalorder %s2274_s5, %s3077_s1  ;;  %p3083_p2 = scmp.lt.s32.totalorder %s3077_s1, %s3077_s1 }
 0x7d2   :  { %v1831_v7 = vadd.f32 %v1829_v0, %v1815_v10 }
 0x7d3   :  { %v1846_v56 = vadd.f32 %v1844_v40, %v1830_v2  ;;  %p3084_p3 = por %p3083_p2, %p3082_p1 }
 0x7d4   :  { %v1847_v5 = vadd.f32 %v1845_v8, %v1831_v7 }
 0x7d5   :  { %v1862_v48 = vadd.f32 %v1860_v9, %v1846_v56  ;;  %p3085_p4 = pnand %p3084_p3, %p3078_p0 }
 0x7d6   :  { %v1863_v12 = vadd.f32 %v1861_v1, %v1847_v5  ;;  %v3119_v5 = vmov 1966171168  }
 0x7d7   :  { %v1878_v37 = vadd.f32 %v1876_v49, %v1862_v48  ;;  %v2248_v1 = vunpack.c.l.s4 %v3119_v5 }
 0x7d8   :  { %v1879_v57 = vadd.f32 %v1877_v3, %v1863_v12 }
 0x7d9   :  { %v1951_v30 = vmul.f32 %v1878_v37, %v1878_v37 }
 0x7da   :  { %1944 = vmatprep.mubr.f32.mxu0 %v1879_v57  ;;  %v1952_v13 = vmul.f32 %v1879_v57, %v1879_v57 }
 0x7db   :  { %1945 = vmatmul.mubr.f32.vlgmr.msra.gmra.mrb[60].mxu0 %v1878_v37 }
 0x7dc   :  { %2017 = vmatprep.mubr.f32.mxu1 %v1952_v13  ;;  %2514 = vmatpush1.msk.msra.mxu0 %vm4285_vm3, %v4268_v26 }
 0x7dd   :  { %2018 = vmatmul.mubr.f32.vlgmr.msra.gmra.mrb[40].mxu1 %v1951_v30  ;;  %2119 = vmatprep.mubr.f32.mxu0 %v4243_v18 }
 0x7de   :  { %2516 = vmatprep.subr.msk.mxu0 %vm4286_vm15, %v3632_v41 }
 0x8ae   :  { %v2739_v25 = vpop.f32.mrb[60].mxu0 }
 0x8af   :  { %v2740_v43 = vpop.f32.mrb[61].mxu0 }
 0x8b0   :  { %v2741_v46 = vadd.f32 %v2740_v43, %v2739_v25  ;;  %v2774_v14 = vpop.f32.mrb[40].mxu1  ;;  %v2249_v25 = vunpack.c.0.s8 %v2248_v1 }
 0x8b1   :  { %v2775_v34 = vpop.f32.mrb[41].mxu1 }
 0x8b2   :  { %v1950_v16 = vmul.f32 0.0078125, %v2741_v46  ;;  %v2776_v4 = vadd.f32 %v2775_v34, %v2774_v14  ;;  %v2252_v14 = vsub.s32 %v2249_v25, %v4284_v17 }
 0x8b4   :  { %v2024_v62 = vmul.f32 %v1950_v16, %v1950_v16  ;;  %v2023_v29 = vmul.f32 0.0078125, %v2776_v4 }
 0x8b6   :  { %v2025_v53 = vsub.f32 %v2023_v29, %v2024_v62  ;;  %v4290_v62 = vlaneseq }
 0x8b8   :  { %v2026_v31 = vmax.f32 %v2025_v53, 0.0  ;;  %vm2264_vm0 = vcmp.lt.s32.totalorder %v4290_v62, 256 }
 0x8ba   :  { %v2027_v42 = vadd.f32 0.001, %v2026_v31 }
 0x8bc   :  { %3073 = vrsqrt.f32 %v2027_v42 }
 0x8c6   :  { %v3074_v63 = vpop.eup %3073 }
 0x8c7   :  { %v2029_v54 = vmul.f32 %v3074_v63, %v2026_v31 }
 0x8c9   :  { %v2030_v51 = vmul.f32 %v3074_v63, %v2029_v54 }
 0x8cb   :  { %v2032_v19 = vsel %vm2031_vm13, %v2030_v51, 0.0 }
 0x8cc   :  { %2033 = vadd.xlane.f32.xlu1 %v2032_v19 }
 0x959   :  { %v2034_v41 = vpop.xlane.xlu1 %2033 }
 0x95a   :  { %v2035_v20 = vmul.f32 0.5, %v2034_v41 }
 0x95c   :  { %v2036_v44 = vadd.f32 1e-05, %v2035_v20 }
 0x95e   :  { %3075 = vrsqrt.f32 %v2036_v44 }
 0x968   :  { %v3076_v39 = vpop.eup %3075 }
 0x969   :  { %v2038_v27 = vmul.f32 %v3076_v39, %v40_v61 }
 0x96b   :  { %2041 = vperm.xlu0 %3029, %v2038_v27  }
 0x96f   :  { %3030 = vset.pattern.permute.xlu0 %v4246_v38 }
 0x970   :  { %2048 = vperm.xlu0 %3030, %v40_v61  }
 0x974   :  { %3031 = vset.pattern.permute.xlu0 %v4247_v47 }
 0x975   :  { %2239 = vperm.xlu0 %3031, %v40_v61  }
 0x9ea   :  { %v2042_v52 = vpop.permute.xlu0 %2041 }
 0x9eb   :  { %v2044_v55 = vmul.f32 %v3074_v63, %v2042_v52 }
 0x9ed   :  { %2515 = vmatmul.mubr.msk.f32.vlgmr.msra.gmra.mrb[62].mxu0 %vm4287_vm6, %v2044_v55  ;;  %v2045_v58 = vmul.f32 %v2044_v55, %v1950_v16 }
 0x9ee   :  { %2517 = vmatpush1.msk.msra.mxu0 %vm4288_vm2, %v4268_v26  ;;  %2193 = vmatprep.mubr.f32.mxu0 %v4243_v18 }
 0x9ef   :  { %v2049_v59 = vpop.permute.xlu0 %2048 }
 0x9f0   :  { %v2051_v60 = vsub.f32 %v2049_v59, %v2045_v58 }
 0x9f2   :  { %2518 = vmatmul.mubr.msk.f32.vlgmr.msra.gmra.mrb[64].mxu0 %vm4289_vm14, %v2051_v60 }
 0x9f4   :  { %v2240_v43 = vpop.permute.xlu0 %2239 }
 0xac0   :  { %v2121_v33 = vpop.f32.mrb[62].mxu0 }
 0xac1   :  { %v2123_v38 = vpop.f32.mrb[63].mxu0  ;;  %v2200_v6 = vmul.f32 %v2121_v33, %v1878_v37 }
 0xac2   :  { %v2201_v15 = vmul.f32 %v2123_v38, %v1879_v57 }
 0xac5   :  { %v2195_v47 = vpop.f32.mrb[64].mxu0 }
 0xac6   :  { %v2202_v11 = vadd.f32 %v2200_v6, %v2195_v47  ;;  %v2197_v23 = vpop.f32.mrb[65].mxu0 }
 0xac7   :  { %v2203_v10 = vadd.f32 %v2201_v15, %v2197_v23 }
 0xac8   :  { %v2204_v0 = vmax.f32 %v2202_v11, 0.0 }
 0xac9   :  { %v2205_v22 = vmax.f32 %v2203_v10, 0.0 }
 0xaca   :  { %v2208_v35 = vrot.slane %v2204_v0, 4  ;;  %v2214_v40 = vrot.slane %v2204_v0, 5  ;;  %v2222_v2 = vrot.slane %v2204_v0, 6  ;;  %v2230_v36 = vrot.slane %v2204_v0, 7 }
 0xacb   :  { %v2209_v26 = vrot.slane %v2205_v22, 4  ;;  %v2215_v45 = vrot.slane %v2205_v22, 5  ;;  %v2223_v18 = vrot.slane %v2205_v22, 6  ;;  %v2231_v9 = vrot.slane %v2205_v22, 7 }
 0xacc   :  { %v2212_v8 = vmul.f32 %v2208_v35, %v3996_v21  ;;  %v2218_v7 = vmul.f32 %v2214_v40, %v3998_v24  ;;  %v2226_v49 = vmul.f32 %v2222_v2, %v4000_v28  ;;  %v2234_v57 = vmul.f32 %v2230_v36, %v4002_v32 }
 0xacd   :  { %v2213_v50 = vmul.f32 %v2209_v26, %v3996_v21  ;;  %v2219_v56 = vmul.f32 %v2215_v45, %v3998_v24  ;;  %v2227_v3 = vmul.f32 %v2223_v18, %v4000_v28  ;;  %v2235_v30 = vmul.f32 %v2231_v9, %v4002_v32 }
 0xace   :  { %v2220_v48 = vadd.f32 %v2218_v7, %v2212_v8 }
 0xacf   :  { %v2221_v12 = vadd.f32 %v2219_v56, %v2213_v50 }
 0xad0   :  { %v2228_v37 = vadd.f32 %v2226_v49, %v2220_v48 }
 0xad1   :  { %v2229_v13 = vadd.f32 %v2227_v3, %v2221_v12 }
 0xad2   :  { %v2236_v21 = vadd.f32 %v2234_v57, %v2228_v37 }
 0xad3   :  { %v2237_v46 = vadd.f32 %v2235_v30, %v2229_v13 }
 0xad4   :  { %v2242_v24 = vadd.f32 %v2240_v43, %v2236_v21 }
 0xad5   :  { %v2243_v34 = vadd.f32 %v2240_v43, %v2237_v46 }
 0xad7   :  { %v2246_v16 = vcombine.high %v2242_v24, %v2243_v34 }
 0xad9   :  { %v2253_v4 = vrot.slane %v2246_v16, %v2252_v14 }
 0xadb   :  { %v2260_v28 = vrot.slane %v2253_v4, %v2252_v14 }
 0xadd   :  { %2266 = vst.msk [vmem:[#allocation2] sm:$0x3] %vm2264_vm0, %v2260_v28 }
 0xade   :  { %3088 = shalt.err (!%p3085_p4)
}
 0xadf   :  { %s3089_s8 = scalar_lea.hbm %s4151_s4, 32 }
 0xae0   :  { %p3090_p5 = scmp.ne.s32.totalorder %s4151_s4, %s3089_s8  ;;  %p3093_p6 = scmp.lt.u32.totalorder %s3089_s8, %s4151_s4 }
 0xae2   :  { %p3095_p7 = pnand %p3093_p6, %p3090_p5 }
 0xae4   :  { %3098 = shalt.err (!%p3095_p7)
}
 0xae5   :  { %2276 = dma.vmem_to_hbm [thread:$0]  %s2274_s5, 32, %s4151_s4, [#allocation3]  }
 0xae6   :  { %3099 = dma.done.wait [#allocation3], 32  }
 0xae7   :  { %3100 = vsyncadd [#allocation3], 4294967264 }
 0xae8   :  { %2280 = vsyncpa [#allocation3], 1 }

</bundles_post_ra>
